<compile_context>
chip_gen: v7x
topology: tpu7x:2x2x1
jax: 0.10.0
libtpu: 0.0.40
codegen_flags: <defaults>
</compile_context>

<pallas_src>
import jax
import jax.numpy as jnp
from jax import lax
from jax.experimental import pallas as pl
from jax.experimental.pallas import tpu as pltpu


def _round_up(a, b):
    return (a + b - 1) // b * b


def _divisors(n):
    ds = set()
    i = 1
    while i * i <= n:
        if n % i == 0:
            ds.add(i)
            ds.add(n // i)
        i += 1
    return sorted(ds)


def _pick_fold(m, w, ffw, max_g=32, max_out_lanes=8192):
    """Fold factor g (divides m): g consecutive input rows form one kernel row
    so the output row (g*ffw lanes) is lane-dense (multiple of 128)."""
    best_g, best_key = 1, (ffw % 128 == 0, w >= 128, -1)
    for g in _divisors(m):
        if g > max_g or g * ffw > max_out_lanes:
            continue
        key = ((g * ffw) % 128 == 0, g * w >= 128, -g)
        if key > best_key:
            best_g, best_key = g, key
    return best_g


def _pick_kc(w):
    """Contraction chunk: cap MXU K-dim (and R1 residency) for large W."""
    if w <= 256:
        return w
    if w % 256 == 0:
        return 256
    if w % 128 == 0:
        return 128
    # TODO(synk): W > 256 and not a multiple of 128 keeps a W-wide R1 (rare).
    return w


def _pick_block_rows(mg, per_row_bytes, sublane, budget_bytes):
    """Row-tile: sublane-aligned, fits the VMEM budget, targets >=8 grid steps
    (>=2 as a floor) so both v7x TensorCores get a pipelined stream."""
    if mg <= sublane:
        return mg
    mb = max(sublane, (budget_bytes // max(per_row_bytes, 1)) // sublane * sublane)
    caps = [mb, (mg // sublane) * sublane]
    for target in (8, 2):
        c = (mg // target) // sublane * sublane
        if c >= sublane:
            caps.append(c)
            break
    return max(sublane, min(caps))


def _make_upsample_kernel(g, n_chunks, f, w, kc, exact_f32):
    wf = w * f          # one upsampled row
    ffw = f * wf        # full expansion of one input row (f row replicas)
    kcf = kc * f        # width of one chunk's lane-replicated result
    prec = lax.Precision.HIGHEST if exact_f32 else None

    def kernel(r1_ref, x_ref, o_ref):
        r1 = r1_ref[...]
        for k in range(g):              # folded sub-rows
            for c in range(n_chunks):   # K-dim chunks of W
                t = jnp.dot(
                    x_ref[:, k * w + c * kc: k * w + (c + 1) * kc],
                    r1,
                    precision=prec,
                    preferred_element_type=o_ref.dtype,
                )
                base = k * ffw + c * kcf
                for j in range(f):      # row replication = plain stores
                    o_ref[:, base + j * wf: base + j * wf + kcf] = t

    return kernel


def upsample2_nearest(x, scale_factor, mode="nearest"):
    """Equivalent of Upsample2(scale_factor, mode='nearest').forward(x), NCHW."""
    assert mode == "nearest", "only mode='nearest' is implemented"
    # TODO(synk): 'bilinear'/'bicubic' need weighted interpolation matrices and
    # boundary handling; not implemented here.
    f_float = float(scale_factor)
    f = int(round(f_float))
    assert f == f_float and f >= 1, (
        "only integer scale factors supported (PyTorch 'nearest' with "
        "non-integer factors has different index semantics)")
    assert jnp.issubdtype(x.dtype, jnp.floating), "only floating dtypes supported"

    N, C, H, W = x.shape
    if f == 1:
        return x

    M = N * C * H
    Wf = W * f
    ffW = f * Wf
    itemsize = jnp.dtype(x.dtype).itemsize
    sublane = max(8, 32 // itemsize)          # 8 for f32, 16 for bf16

    # Shared lane-replication matrix: R1[a, q] = 1 iff a == q // f.
    Kc = _pick_kc(W)
    n_chunks = W // Kc
    a = jnp.arange(Kc, dtype=jnp.int32)
    q = jnp.arange(Kc * f, dtype=jnp.int32)
    r1 = (a[:, None] == (q[None, :] // f)).astype(x.dtype)

    # Row folding for lane-dense output rows.
    g = _pick_fold(M, W, ffW)
    Mg = M // g
    in_row = g * W
    out_row = g * ffW
    x2d = x.reshape(Mg, in_row)

    # Per-chip VMEM budget.
    try:
        vmem_cap = int(pltpu.get_tpu_info().vmem_capacity_bytes)
    except Exception:
        vmem_cap = 64 * 1024 * 1024           # conservative (v7x-sized)
    vmem_limit = int(min(vmem_cap * 3 // 4, 96 * 1024 * 1024))

    r1_bytes = _round_up(Kc, sublane) * _round_up(Kc * f, 128) * itemsize
    per_row = (2 * _round_up(in_row, 128) * itemsize     # x tile, double-buffered
               + 2 * _round_up(out_row, 128) * itemsize  # out tile, double-buffered
               + _round_up(Kc * f, 128) * itemsize)      # matmul intermediate
    budget = max(per_row * sublane, vmem_limit - 2 * r1_bytes - (2 << 20))

    Mb = _pick_block_rows(Mg, per_row, sublane, budget)
    grid = (pl.cdiv(Mg, Mb),)                 # ragged tail allowed

    kernel = _make_upsample_kernel(
        g, n_chunks, f, W, Kc, exact_f32=(jnp.dtype(x.dtype) == jnp.float32))

    cost = pl.CostEstimate(
        flops=2 * M * W * Kc * f,
        transcendentals=0,
        bytes_accessed=(M * W + M * ffW + Kc * Kc * f) * itemsize,
    )

    def _run(r1_spec):
        return pl.pallas_call(
            kernel,
            out_shape=jax.ShapeDtypeStruct((Mg, out_row), x.dtype),
            grid_spec=pltpu.PrefetchScalarGridSpec(
                num_scalar_prefetch=0,
                grid=grid,
                in_specs=[
                    r1_spec,                                        # R1, resident
                    pl.BlockSpec((Mb, in_row), lambda i: (i, 0)),   # x rows
                ],
                out_specs=pl.BlockSpec((Mb, out_row), lambda i: (i, 0)),
            ),
            compiler_params=pltpu.CompilerParams(
                dimension_semantics=("parallel",),
                vmem_limit_bytes=vmem_limit,
            ),
            cost_estimate=cost,
        )(r1, x2d)

    try:
        # Single-buffer the constant matrix (constant index_map, fetched once).
        out2d = _run(pl.BlockSpec((Kc, Kc * f), lambda i: (0, 0),
                                  pipeline_mode=pl.Buffered(1)))
    except Exception:
        # Fallback for JAX versions without single-buffering support; any
        # unrelated error re-raises identically from this second call.
        out2d = _run(pl.BlockSpec((Kc, Kc * f), lambda i: (0, 0)))

    # Metadata-only reshape back to NCHW.
    return out2d.reshape(N, C, H * f, W * f)


if __name__ == "__main__":
    key = jax.random.PRNGKey(0)
    N, C, H, W = 2, 4, 16, 16
    factor = 2

    # float32 check (bit-exact via precision=HIGHEST on the 0/1 matmul).
    x = jax.random.normal(key, (N, C, H, W), dtype=jnp.float32)
    out = jax.block_until_ready(upsample2_nearest(x, scale_factor=factor))
    ref = jnp.repeat(jnp.repeat(x, factor, axis=2), factor, axis=3)
    assert out.shape == (N, C, H * factor, W * factor), out.shape
    assert out.dtype == x.dtype, out.dtype
    assert bool(jnp.all(out == ref)), "float32 mismatch vs reference"

    # bfloat16 check (bf16 written directly from the MXU; still bit-exact).
    xb = x.astype(jnp.bfloat16)
    outb = jax.block_until_ready(upsample2_nearest(xb, scale_factor=factor))
    refb = jnp.repeat(jnp.repeat(xb, factor, axis=2), factor, axis=3)
    assert outb.dtype == jnp.bfloat16, outb.dtype
    assert bool(jnp.all(outb == refb)), "bfloat16 mismatch vs reference"

    # scale factor 3 on an odd shape exercises folding + the ragged-grid path.
    x3 = jax.random.normal(jax.random.PRNGKey(1), (1, 3, 12, 32), dtype=jnp.float32)
    out3 = jax.block_until_ready(upsample2_nearest(x3, scale_factor=3))
    ref3 = jnp.repeat(jnp.repeat(x3, 3, axis=2), 3, axis=3)
    assert out3.shape == (1, 3, 36, 96), out3.shape
    assert bool(jnp.all(out3 == ref3)), "scale-3 mismatch vs reference"

    print("KERNEL_OK")
</pallas_src>

<mosaic_0001>
module attributes {stable_mosaic.version = 11 : i64} {
  func.func @kernel(%arg0: i32, %arg1: memref<16x32xf32, #tpu.memory_space<vmem>>, %arg2: memref<8x128xf32, #tpu.memory_space<vmem>>, %arg3: memref<8x512xf32, #tpu.memory_space<vmem>>) attributes {dimension_semantics = [#tpu.dimension_semantics<parallel>], iteration_bounds = array<i64: 2>, scalar_prefetch = 0 : i64, scratch_operands = 0 : i64, tpu.core_type = #tpu.core_type<tc>, window_params = [{pipeline_mode = #tpu.pipeline_mode<synchronous>, transform_indices = @transform_0, window_bounds = array<i64: 16, 32>}, {transform_indices = @transform_1, window_bounds = array<i64: 8, 128>}, {transform_indices = @transform_2, window_bounds = array<i64: 8, 512>}]} {
    %c0 = arith.constant 0 : index
    %c0_0 = arith.constant 0 : index
    %0 = vector.load %arg1[%c0, %c0_0] : memref<16x32xf32, #tpu.memory_space<vmem>>, vector<16x32xf32>
    %c0_1 = arith.constant 0 : index
    %c0_2 = arith.constant 0 : index
    %1 = vector.load %arg2[%c0_1, %c0_2] : memref<8x128xf32, #tpu.memory_space<vmem>>, vector<8x16xf32>
    %cst = arith.constant dense<0.000000e+00> : vector<8x32xf32>
    %2 = tpu.matmul %1, %0, %cst {dimension_numbers = #tpu.dot_dimension_numbers<[1], [0], [0], [1], [0, 0, 1, 1], [], []>, precision = #tpu.contract_precision<fp32>} : vector<8x16xf32>, vector<16x32xf32>, vector<8x32xf32> -> vector<8x32xf32>
    %c0_3 = arith.constant 0 : index
    %c0_4 = arith.constant 0 : index
    %3 = vector.load %arg3[%c0_3, %c0_4] : memref<8x512xf32, #tpu.memory_space<vmem>>, vector<8x32xf32>
    tpu.vector_store %arg3[%c0_3, %c0_4], %2 {strides = array<i32>} : memref<8x512xf32, #tpu.memory_space<vmem>>, vector<8x32xf32>,
    %c0_5 = arith.constant 0 : index
    %c32 = arith.constant 32 : index
    %4 = vector.load %arg3[%c0_5, %c32] : memref<8x512xf32, #tpu.memory_space<vmem>>, vector<8x32xf32>
    tpu.vector_store %arg3[%c0_5, %c32], %2 {strides = array<i32>} : memref<8x512xf32, #tpu.memory_space<vmem>>, vector<8x32xf32>,
    %c0_6 = arith.constant 0 : index
    %c16 = arith.constant 16 : index
    %5 = vector.load %arg2[%c0_6, %c16] : memref<8x128xf32, #tpu.memory_space<vmem>>, vector<8x16xf32>
    %cst_7 = arith.constant dense<0.000000e+00> : vector<8x32xf32>
    %6 = tpu.matmul %5, %0, %cst_7 {dimension_numbers = #tpu.dot_dimension_numbers<[1], [0], [0], [1], [0, 0, 1, 1], [], []>, precision = #tpu.contract_precision<fp32>} : vector<8x16xf32>, vector<16x32xf32>, vector<8x32xf32> -> vector<8x32xf32>
    %c0_8 = arith.constant 0 : index
    %c64 = arith.constant 64 : index
    %7 = vector.load %arg3[%c0_8, %c64] : memref<8x512xf32, #tpu.memory_space<vmem>>, vector<8x32xf32>
    tpu.vector_store %arg3[%c0_8, %c64], %6 {strides = array<i32>} : memref<8x512xf32, #tpu.memory_space<vmem>>, vector<8x32xf32>,
    %c0_9 = arith.constant 0 : index
    %c96 = arith.constant 96 : index
    %8 = vector.load %arg3[%c0_9, %c96] : memref<8x512xf32, #tpu.memory_space<vmem>>, vector<8x32xf32>
    tpu.vector_store %arg3[%c0_9, %c96], %6 {strides = array<i32>} : memref<8x512xf32, #tpu.memory_space<vmem>>, vector<8x32xf32>,
    %c0_10 = arith.constant 0 : index
    %c32_11 = arith.constant 32 : index
    %9 = vector.load %arg2[%c0_10, %c32_11] : memref<8x128xf32, #tpu.memory_space<vmem>>, vector<8x16xf32>
    %cst_12 = arith.constant dense<0.000000e+00> : vector<8x32xf32>
    %10 = tpu.matmul %9, %0, %cst_12 {dimension_numbers = #tpu.dot_dimension_numbers<[1], [0], [0], [1], [0, 0, 1, 1], [], []>, precision = #tpu.contract_precision<fp32>} : vector<8x16xf32>, vector<16x32xf32>, vector<8x32xf32> -> vector<8x32xf32>
    %c0_13 = arith.constant 0 : index
    %c128 = arith.constant 128 : index
    %11 = vector.load %arg3[%c0_13, %c128] : memref<8x512xf32, #tpu.memory_space<vmem>>, vector<8x32xf32>
    tpu.vector_store %arg3[%c0_13, %c128], %10 {strides = array<i32>} : memref<8x512xf32, #tpu.memory_space<vmem>>, vector<8x32xf32>,
    %c0_14 = arith.constant 0 : index
    %c160 = arith.constant 160 : index
    %12 = vector.load %arg3[%c0_14, %c160] : memref<8x512xf32, #tpu.memory_space<vmem>>, vector<8x32xf32>
    tpu.vector_store %arg3[%c0_14, %c160], %10 {strides = array<i32>} : memref<8x512xf32, #tpu.memory_space<vmem>>, vector<8x32xf32>,
    %c0_15 = arith.constant 0 : index
    %c48 = arith.constant 48 : index
    %13 = vector.load %arg2[%c0_15, %c48] : memref<8x128xf32, #tpu.memory_space<vmem>>, vector<8x16xf32>
    %cst_16 = arith.constant dense<0.000000e+00> : vector<8x32xf32>
    %14 = tpu.matmul %13, %0, %cst_16 {dimension_numbers = #tpu.dot_dimension_numbers<[1], [0], [0], [1], [0, 0, 1, 1], [], []>, precision = #tpu.contract_precision<fp32>} : vector<8x16xf32>, vector<16x32xf32>, vector<8x32xf32> -> vector<8x32xf32>
    %c0_17 = arith.constant 0 : index
    %c192 = arith.constant 192 : index
    %15 = vector.load %arg3[%c0_17, %c192] : memref<8x512xf32, #tpu.memory_space<vmem>>, vector<8x32xf32>
    tpu.vector_store %arg3[%c0_17, %c192], %14 {strides = array<i32>} : memref<8x512xf32, #tpu.memory_space<vmem>>, vector<8x32xf32>,
    %c0_18 = arith.constant 0 : index
    %c224 = arith.constant 224 : index
    %16 = vector.load %arg3[%c0_18, %c224] : memref<8x512xf32, #tpu.memory_space<vmem>>, vector<8x32xf32>
    tpu.vector_store %arg3[%c0_18, %c224], %14 {strides = array<i32>} : memref<8x512xf32, #tpu.memory_space<vmem>>, vector<8x32xf32>,
    %c0_19 = arith.constant 0 : index
    %c64_20 = arith.constant 64 : index
    %17 = vector.load %arg2[%c0_19, %c64_20] : memref<8x128xf32, #tpu.memory_space<vmem>>, vector<8x16xf32>
    %cst_21 = arith.constant dense<0.000000e+00> : vector<8x32xf32>
    %18 = tpu.matmul %17, %0, %cst_21 {dimension_numbers = #tpu.dot_dimension_numbers<[1], [0], [0], [1], [0, 0, 1, 1], [], []>, precision = #tpu.contract_precision<fp32>} : vector<8x16xf32>, vector<16x32xf32>, vector<8x32xf32> -> vector<8x32xf32>
    %c0_22 = arith.constant 0 : index
    %c256 = arith.constant 256 : index
    %19 = vector.load %arg3[%c0_22, %c256] : memref<8x512xf32, #tpu.memory_space<vmem>>, vector<8x32xf32>
    tpu.vector_store %arg3[%c0_22, %c256], %18 {strides = array<i32>} : memref<8x512xf32, #tpu.memory_space<vmem>>, vector<8x32xf32>,
    %c0_23 = arith.constant 0 : index
    %c288 = arith.constant 288 : index
    %20 = vector.load %arg3[%c0_23, %c288] : memref<8x512xf32, #tpu.memory_space<vmem>>, vector<8x32xf32>
    tpu.vector_store %arg3[%c0_23, %c288], %18 {strides = array<i32>} : memref<8x512xf32, #tpu.memory_space<vmem>>, vector<8x32xf32>,
    %c0_24 = arith.constant 0 : index
    %c80 = arith.constant 80 : index
    %21 = vector.load %arg2[%c0_24, %c80] : memref<8x128xf32, #tpu.memory_space<vmem>>, vector<8x16xf32>
    %cst_25 = arith.constant dense<0.000000e+00> : vector<8x32xf32>
    %22 = tpu.matmul %21, %0, %cst_25 {dimension_numbers = #tpu.dot_dimension_numbers<[1], [0], [0], [1], [0, 0, 1, 1], [], []>, precision = #tpu.contract_precision<fp32>} : vector<8x16xf32>, vector<16x32xf32>, vector<8x32xf32> -> vector<8x32xf32>
    %c0_26 = arith.constant 0 : index
    %c320 = arith.constant 320 : index
    %23 = vector.load %arg3[%c0_26, %c320] : memref<8x512xf32, #tpu.memory_space<vmem>>, vector<8x32xf32>
    tpu.vector_store %arg3[%c0_26, %c320], %22 {strides = array<i32>} : memref<8x512xf32, #tpu.memory_space<vmem>>, vector<8x32xf32>,
    %c0_27 = arith.constant 0 : index
    %c352 = arith.constant 352 : index
    %24 = vector.load %arg3[%c0_27, %c352] : memref<8x512xf32, #tpu.memory_space<vmem>>, vector<8x32xf32>
    tpu.vector_store %arg3[%c0_27, %c352], %22 {strides = array<i32>} : memref<8x512xf32, #tpu.memory_space<vmem>>, vector<8x32xf32>,
    %c0_28 = arith.constant 0 : index
    %c96_29 = arith.constant 96 : index
    %25 = vector.load %arg2[%c0_28, %c96_29] : memref<8x128xf32, #tpu.memory_space<vmem>>, vector<8x16xf32>
    %cst_30 = arith.constant dense<0.000000e+00> : vector<8x32xf32>
    %26 = tpu.matmul %25, %0, %cst_30 {dimension_numbers = #tpu.dot_dimension_numbers<[1], [0], [0], [1], [0, 0, 1, 1], [], []>, precision = #tpu.contract_precision<fp32>} : vector<8x16xf32>, vector<16x32xf32>, vector<8x32xf32> -> vector<8x32xf32>
    %c0_31 = arith.constant 0 : index
    %c384 = arith.constant 384 : index
    %27 = vector.load %arg3[%c0_31, %c384] : memref<8x512xf32, #tpu.memory_space<vmem>>, vector<8x32xf32>
    tpu.vector_store %arg3[%c0_31, %c384], %26 {strides = array<i32>} : memref<8x512xf32, #tpu.memory_space<vmem>>, vector<8x32xf32>,
    %c0_32 = arith.constant 0 : index
    %c416 = arith.constant 416 : index
    %28 = vector.load %arg3[%c0_32, %c416] : memref<8x512xf32, #tpu.memory_space<vmem>>, vector<8x32xf32>
    tpu.vector_store %arg3[%c0_32, %c416], %26 {strides = array<i32>} : memref<8x512xf32, #tpu.memory_space<vmem>>, vector<8x32xf32>,
    %c0_33 = arith.constant 0 : index
    %c112 = arith.constant 112 : index
    %29 = vector.load %arg2[%c0_33, %c112] : memref<8x128xf32, #tpu.memory_space<vmem>>, vector<8x16xf32>
    %cst_34 = arith.constant dense<0.000000e+00> : vector<8x32xf32>
    %30 = tpu.matmul %29, %0, %cst_34 {dimension_numbers = #tpu.dot_dimension_numbers<[1], [0], [0], [1], [0, 0, 1, 1], [], []>, precision = #tpu.contract_precision<fp32>} : vector<8x16xf32>, vector<16x32xf32>, vector<8x32xf32> -> vector<8x32xf32>
    %c0_35 = arith.constant 0 : index
    %c448 = arith.constant 448 : index
    %31 = vector.load %arg3[%c0_35, %c448] : memref<8x512xf32, #tpu.memory_space<vmem>>, vector<8x32xf32>
    tpu.vector_store %arg3[%c0_35, %c448], %30 {strides = array<i32>} : memref<8x512xf32, #tpu.memory_space<vmem>>, vector<8x32xf32>,
    %c0_36 = arith.constant 0 : index
    %c480 = arith.constant 480 : index
    %32 = vector.load %arg3[%c0_36, %c480] : memref<8x512xf32, #tpu.memory_space<vmem>>, vector<8x32xf32>
    tpu.vector_store %arg3[%c0_36, %c480], %30 {strides = array<i32>} : memref<8x512xf32, #tpu.memory_space<vmem>>, vector<8x32xf32>,
    return
  }
  func.func @transform_0(%arg0: i32) -> (i32, i32) {
    %c0_i32 = arith.constant 0 : i32
    %c0_i32_0 = arith.constant 0 : i32
    %c0_i32_1 = arith.constant 0 : i32
    return %c0_i32, %c0_i32_0 : i32, i32
  }
  func.func @transform_1(%arg0: i32) -> (i32, i32) {
    %c0_i32 = arith.constant 0 : i32
    %c0_i32_0 = arith.constant 0 : i32
    return %arg0, %c0_i32 : i32, i32
  }
  func.func @transform_2(%arg0: i32) -> (i32, i32) {
    %c0_i32 = arith.constant 0 : i32
    %c0_i32_0 = arith.constant 0 : i32
    return %arg0, %c0_i32 : i32, i32
  }
}

module attributes {stable_mosaic.version = 11 : i64} {
  func.func @kernel(%arg0: i32, %arg1: memref<16x32xf32, #tpu.memory_space<vmem>>, %arg2: memref<8x128xf32, #tpu.memory_space<vmem>>, %arg3: memref<8x512xf32, #tpu.memory_space<vmem>>) attributes {dimension_semantics = [#tpu.dimension_semantics<parallel>], iteration_bounds = array<i64: 2>, scalar_prefetch = 0 : i64, scratch_operands = 0 : i64, tpu.core_type = #tpu.core_type<tc>, window_params = [{pipeline_mode = #tpu.pipeline_mode<synchronous>, transform_indices = @transform_0, window_bounds = array<i64: 16, 32>}, {transform_indices = @transform_1, window_bounds = array<i64: 8, 128>}, {transform_indices = @transform_2, window_bounds = array<i64: 8, 512>}]} {
    %c0 = arith.constant 0 : index
    %c0_0 = arith.constant 0 : index
    %0 = vector.load %arg1[%c0, %c0_0] : memref<16x32xf32, #tpu.memory_space<vmem>>, vector<16x32xf32>
    %c0_1 = arith.constant 0 : index
    %c0_2 = arith.constant 0 : index
    %1 = vector.load %arg2[%c0_1, %c0_2] : memref<8x128xf32, #tpu.memory_space<vmem>>, vector<8x16xf32>
    %cst = arith.constant dense<0.000000e+00> : vector<8x32xf32>
    %2 = tpu.matmul %1, %0, %cst {dimension_numbers = #tpu.dot_dimension_numbers<[1], [0], [0], [1], [0, 0, 1, 1], [], []>, precision = #tpu.contract_precision<fp32>} : vector<8x16xf32>, vector<16x32xf32>, vector<8x32xf32> -> vector<8x32xf32>
    %c0_3 = arith.constant 0 : index
    %c0_4 = arith.constant 0 : index
    %3 = vector.load %arg3[%c0_3, %c0_4] : memref<8x512xf32, #tpu.memory_space<vmem>>, vector<8x32xf32>
    tpu.vector_store %arg3[%c0_3, %c0_4], %2 {strides = array<i32>} : memref<8x512xf32, #tpu.memory_space<vmem>>, vector<8x32xf32>,
    %c0_5 = arith.constant 0 : index
    %c32 = arith.constant 32 : index
    %4 = vector.load %arg3[%c0_5, %c32] : memref<8x512xf32, #tpu.memory_space<vmem>>, vector<8x32xf32>
    tpu.vector_store %arg3[%c0_5, %c32], %2 {strides = array<i32>} : memref<8x512xf32, #tpu.memory_space<vmem>>, vector<8x32xf32>,
    %c0_6 = arith.constant 0 : index
    %c16 = arith.constant 16 : index
    %5 = vector.load %arg2[%c0_6, %c16] : memref<8x128xf32, #tpu.memory_space<vmem>>, vector<8x16xf32>
    %cst_7 = arith.constant dense<0.000000e+00> : vector<8x32xf32>
    %6 = tpu.matmul %5, %0, %cst_7 {dimension_numbers = #tpu.dot_dimension_numbers<[1], [0], [0], [1], [0, 0, 1, 1], [], []>, precision = #tpu.contract_precision<fp32>} : vector<8x16xf32>, vector<16x32xf32>, vector<8x32xf32> -> vector<8x32xf32>
    %c0_8 = arith.constant 0 : index
    %c64 = arith.constant 64 : index
    %7 = vector.load %arg3[%c0_8, %c64] : memref<8x512xf32, #tpu.memory_space<vmem>>, vector<8x32xf32>
    tpu.vector_store %arg3[%c0_8, %c64], %6 {strides = array<i32>} : memref<8x512xf32, #tpu.memory_space<vmem>>, vector<8x32xf32>,
    %c0_9 = arith.constant 0 : index
    %c96 = arith.constant 96 : index
    %8 = vector.load %arg3[%c0_9, %c96] : memref<8x512xf32, #tpu.memory_space<vmem>>, vector<8x32xf32>
    tpu.vector_store %arg3[%c0_9, %c96], %6 {strides = array<i32>} : memref<8x512xf32, #tpu.memory_space<vmem>>, vector<8x32xf32>,
    %c0_10 = arith.constant 0 : index
    %c32_11 = arith.constant 32 : index
    %9 = vector.load %arg2[%c0_10, %c32_11] : memref<8x128xf32, #tpu.memory_space<vmem>>, vector<8x16xf32>
    %cst_12 = arith.constant dense<0.000000e+00> : vector<8x32xf32>
    %10 = tpu.matmul %9, %0, %cst_12 {dimension_numbers = #tpu.dot_dimension_numbers<[1], [0], [0], [1], [0, 0, 1, 1], [], []>, precision = #tpu.contract_precision<fp32>} : vector<8x16xf32>, vector<16x32xf32>, vector<8x32xf32> -> vector<8x32xf32>
    %c0_13 = arith.constant 0 : index
    %c128 = arith.constant 128 : index
    %11 = vector.load %arg3[%c0_13, %c128] : memref<8x512xf32, #tpu.memory_space<vmem>>, vector<8x32xf32>
    tpu.vector_store %arg3[%c0_13, %c128], %10 {strides = array<i32>} : memref<8x512xf32, #tpu.memory_space<vmem>>, vector<8x32xf32>,
    %c0_14 = arith.constant 0 : index
    %c160 = arith.constant 160 : index
    %12 = vector.load %arg3[%c0_14, %c160] : memref<8x512xf32, #tpu.memory_space<vmem>>, vector<8x32xf32>
    tpu.vector_store %arg3[%c0_14, %c160], %10 {strides = array<i32>} : memref<8x512xf32, #tpu.memory_space<vmem>>, vector<8x32xf32>,
    %c0_15 = arith.constant 0 : index
    %c48 = arith.constant 48 : index
    %13 = vector.load %arg2[%c0_15, %c48] : memref<8x128xf32, #tpu.memory_space<vmem>>, vector<8x16xf32>
    %cst_16 = arith.constant dense<0.000000e+00> : vector<8x32xf32>
    %14 = tpu.matmul %13, %0, %cst_16 {dimension_numbers = #tpu.dot_dimension_numbers<[1], [0], [0], [1], [0, 0, 1, 1], [], []>, precision = #tpu.contract_precision<fp32>} : vector<8x16xf32>, vector<16x32xf32>, vector<8x32xf32> -> vector<8x32xf32>
    %c0_17 = arith.constant 0 : index
    %c192 = arith.constant 192 : index
    %15 = vector.load %arg3[%c0_17, %c192] : memref<8x512xf32, #tpu.memory_space<vmem>>, vector<8x32xf32>
    tpu.vector_store %arg3[%c0_17, %c192], %14 {strides = array<i32>} : memref<8x512xf32, #tpu.memory_space<vmem>>, vector<8x32xf32>,
    %c0_18 = arith.constant 0 : index
    %c224 = arith.constant 224 : index
    %16 = vector.load %arg3[%c0_18, %c224] : memref<8x512xf32, #tpu.memory_space<vmem>>, vector<8x32xf32>
    tpu.vector_store %arg3[%c0_18, %c224], %14 {strides = array<i32>} : memref<8x512xf32, #tpu.memory_space<vmem>>, vector<8x32xf32>,
    %c0_19 = arith.constant 0 : index
    %c64_20 = arith.constant 64 : index
    %17 = vector.load %arg2[%c0_19, %c64_20] : memref<8x128xf32, #tpu.memory_space<vmem>>, vector<8x16xf32>
    %cst_21 = arith.constant dense<0.000000e+00> : vector<8x32xf32>
    %18 = tpu.matmul %17, %0, %cst_21 {dimension_numbers = #tpu.dot_dimension_numbers<[1], [0], [0], [1], [0, 0, 1, 1], [], []>, precision = #tpu.contract_precision<fp32>} : vector<8x16xf32>, vector<16x32xf32>, vector<8x32xf32> -> vector<8x32xf32>
    %c0_22 = arith.constant 0 : index
    %c256 = arith.constant 256 : index
    %19 = vector.load %arg3[%c0_22, %c256] : memref<8x512xf32, #tpu.memory_space<vmem>>, vector<8x32xf32>
    tpu.vector_store %arg3[%c0_22, %c256], %18 {strides = array<i32>} : memref<8x512xf32, #tpu.memory_space<vmem>>, vector<8x32xf32>,
    %c0_23 = arith.constant 0 : index
    %c288 = arith.constant 288 : index
    %20 = vector.load %arg3[%c0_23, %c288] : memref<8x512xf32, #tpu.memory_space<vmem>>, vector<8x32xf32>
    tpu.vector_store %arg3[%c0_23, %c288], %18 {strides = array<i32>} : memref<8x512xf32, #tpu.memory_space<vmem>>, vector<8x32xf32>,
    %c0_24 = arith.constant 0 : index
    %c80 = arith.constant 80 : index
    %21 = vector.load %arg2[%c0_24, %c80] : memref<8x128xf32, #tpu.memory_space<vmem>>, vector<8x16xf32>
    %cst_25 = arith.constant dense<0.000000e+00> : vector<8x32xf32>
    %22 = tpu.matmul %21, %0, %cst_25 {dimension_numbers = #tpu.dot_dimension_numbers<[1], [0], [0], [1], [0, 0, 1, 1], [], []>, precision = #tpu.contract_precision<fp32>} : vector<8x16xf32>, vector<16x32xf32>, vector<8x32xf32> -> vector<8x32xf32>
    %c0_26 = arith.constant 0 : index
    %c320 = arith.constant 320 : index
    %23 = vector.load %arg3[%c0_26, %c320] : memref<8x512xf32, #tpu.memory_space<vmem>>, vector<8x32xf32>
    tpu.vector_store %arg3[%c0_26, %c320], %22 {strides = array<i32>} : memref<8x512xf32, #tpu.memory_space<vmem>>, vector<8x32xf32>,
    %c0_27 = arith.constant 0 : index
    %c352 = arith.constant 352 : index
    %24 = vector.load %arg3[%c0_27, %c352] : memref<8x512xf32, #tpu.memory_space<vmem>>, vector<8x32xf32>
    tpu.vector_store %arg3[%c0_27, %c352], %22 {strides = array<i32>} : memref<8x512xf32, #tpu.memory_space<vmem>>, vector<8x32xf32>,
    %c0_28 = arith.constant 0 : index
    %c96_29 = arith.constant 96 : index
    %25 = vector.load %arg2[%c0_28, %c96_29] : memref<8x128xf32, #tpu.memory_space<vmem>>, vector<8x16xf32>
    %cst_30 = arith.constant dense<0.000000e+00> : vector<8x32xf32>
    %26 = tpu.matmul %25, %0, %cst_30 {dimension_numbers = #tpu.dot_dimension_numbers<[1], [0], [0], [1], [0, 0, 1, 1], [], []>, precision = #tpu.contract_precision<fp32>} : vector<8x16xf32>, vector<16x32xf32>, vector<8x32xf32> -> vector<8x32xf32>
    %c0_31 = arith.constant 0 : index
    %c384 = arith.constant 384 : index
    %27 = vector.load %arg3[%c0_31, %c384] : memref<8x512xf32, #tpu.memory_space<vmem>>, vector<8x32xf32>
    tpu.vector_store %arg3[%c0_31, %c384], %26 {strides = array<i32>} : memref<8x512xf32, #tpu.memory_space<vmem>>, vector<8x32xf32>,
    %c0_32 = arith.constant 0 : index
    %c416 = arith.constant 416 : index
    %28 = vector.load %arg3[%c0_32, %c416] : memref<8x512xf32, #tpu.memory_space<vmem>>, vector<8x32xf32>
    tpu.vector_store %arg3[%c0_32, %c416], %26 {strides = array<i32>} : memref<8x512xf32, #tpu.memory_space<vmem>>, vector<8x32xf32>,
    %c0_33 = arith.constant 0 : index
    %c112 = arith.constant 112 : index
    %29 = vector.load %arg2[%c0_33, %c112] : memref<8x128xf32, #tpu.memory_space<vmem>>, vector<8x16xf32>
    %cst_34 = arith.constant dense<0.000000e+00> : vector<8x32xf32>
    %30 = tpu.matmul %29, %0, %cst_34 {dimension_numbers = #tpu.dot_dimension_numbers<[1], [0], [0], [1], [0, 0, 1, 1], [], []>, precision = #tpu.contract_precision<fp32>} : vector<8x16xf32>, vector<16x32xf32>, vector<8x32xf32> -> vector<8x32xf32>
    %c0_35 = arith.constant 0 : index
    %c448 = arith.constant 448 : index
    %31 = vector.load %arg3[%c0_35, %c448] : memref<8x512xf32, #tpu.memory_space<vmem>>, vector<8x32xf32>
    tpu.vector_store %arg3[%c0_35, %c448], %30 {strides = array<i32>} : memref<8x512xf32, #tpu.memory_space<vmem>>, vector<8x32xf32>,
    %c0_36 = arith.constant 0 : index
    %c480 = arith.constant 480 : index
    %32 = vector.load %arg3[%c0_36, %c480] : memref<8x512xf32, #tpu.memory_space<vmem>>, vector<8x32xf32>
    tpu.vector_store %arg3[%c0_36, %c480], %30 {strides = array<i32>} : memref<8x512xf32, #tpu.memory_space<vmem>>, vector<8x32xf32>,
    return
  }
  func.func @transform_0(%arg0: i32) -> (i32, i32) {
    %c0_i32 = arith.constant 0 : i32
    %c0_i32_0 = arith.constant 0 : i32
    %c0_i32_1 = arith.constant 0 : i32
    return %c0_i32, %c0_i32_0 : i32, i32
  }
  func.func @transform_1(%arg0: i32) -> (i32, i32) {
    %c0_i32 = arith.constant 0 : i32
    %c0_i32_0 = arith.constant 0 : i32
    return %arg0, %c0_i32 : i32, i32
  }
  func.func @transform_2(%arg0: i32) -> (i32, i32) {
    %c0_i32 = arith.constant 0 : i32
    %c0_i32_0 = arith.constant 0 : i32
    return %arg0, %c0_i32 : i32, i32
  }
}

</mosaic_0001>

<bundles_post_ra>
// kernel: tpu_custom_call.1
= control target key start
LH: loop header
LB: loop body
LE: loop exit
PB: predicated region body
PF: predicated region fallthrough
CT: control target
= control target key end

     0   :  { %7 = vsyncpa [#allocation3], 0  ;;  %s5496_s0 = inlined_call_operand.hbm [shape: f32[16,32], index: 0, kind: input, shape index: {}]   ;;  %s5497_s1 = inlined_call_operand.hbm [shape: f32[16,128], index: 1, kind: input, shape index: {}]   ;;  %s5498_s2 = inlined_call_operand.hbm [shape: f32[16,512], index: 2, kind: output, shape index: {}]  }
   0x1   :  { %8 = vsyncpa [#allocation6], 0 }
   0x2   :  { %10 = vsyncpa [#allocation6 + $0x1], 0 }
   0x3   :  { %11 = vsyncpa [#allocation4], 0 }
   0x4   :  { %13 = vsyncpa [#allocation4 + $0x1], 0  ;;  %s5005_s9 = smov 0   ;;  %s5007_s10 = smov 0  }
   0x5   :  { %s5009_s11 = smov 0   ;;  %s5011_s12 = smov 0  }
   0x6 LB: > { %s5026_s13 = sadd.s32 4294967295, %s4973_s12   ;;  %s4056_s14 = sadd.s32 4294967294, %s4973_s12   ;;  %s4973_s12 = sphi %s5011_s12, %s5518_s12   ;;  %s4969_s11 = sphi %s5009_s11, %s5517_s11   ;;  %s4965_s10 = sphi %s5007_s10, %s5516_s10   ;;  %s4961_s9 = sphi %s5005_s9, %s5515_s9  }
   0x7   : > { %p60_p0 = scmp.ne.s32.totalorder %s4965_s10, %s4961_s9  ;;  %p5499_p1 = scmp.eq.s32.totalorder %s5026_s13, 0 }
   0x8   : > { %p90_p3 = scmp.eq.s32.totalorder %s4056_s14, 1  ;;  %p4057_p5 = scmp.ge.s32.totalorder %s4973_s12, 1 }
   0x9   : > { %p5035_p4 = por %p5499_p1, %p60_p0  ;;  %p97_p7 = scmp.lt.s32.totalorder %s4973_s12, 3 }
   0xa   : > { %p5040_p6 = por %p90_p3, %p60_p0  ;;  %s4975_s18 = smov [#allocation2]  }
   0xb   : > { %s5502_s15 = scalar_select %p5035_p4, 1, 0 }
   0xc   : > { %s5503_s16 = scalar_select %p5040_p6, 1, 0 }
   0xd   : > { %p5045_p8 = pnand %p4057_p5, %p97_p7  ;;  %s109_s19 = sshll.u32 %s4975_s18, 4  ;;  %s5049_s19 = int_to_ptr.vmem [resolvable:$true] %s109_s19 }
   0xe   : > { %s5061_s21 = sadd.s32 1, %s4973_s12   ;;  %s47_s22 = sadd.s32 1, %s4969_s11 }
   0xf   : > { %s5504_s17 = scalar_select %p5045_p8, 1, 0 }
  0x10   : > { %p4784_p9 = pneg %p5045_p8  ;;  %s44_s23 = ssub.s32 %s4973_s12, %s5061_s21 }
  0x11   : > { %s4845_s26 = scalar_lea.hbm %s5496_s0, 256 }
  0x12   : > { %p5056_p11 = pnand %p4784_p9, %p5499_p1  ;;  %p4846_p12 = scmp.ne.s32.totalorder %s5496_s0, %s4845_s26 }
  0x13   : > { %p4852_p5 = scmp.lt.u32.totalorder %s4845_s26, %s5496_s0 }
  0x14   : > { %p4847_p13 = pneg %p5056_p11 }
  0x16   : > { %p4848_p0 = pnand %p4847_p13, %p4846_p12 }
  0x18   : > { %p4849_p3 = pneg %p4848_p0 }
  0x1a   : > { %p4854_p7 = pnand %p4852_p5, %p4849_p3 }
  0x1c   : > { %4857 = shalt.err (!%p4854_p7)
}
  0x1d   : > { %s4858_s3 = scalar_lea.vmem %s5049_s19, 256  ;;  %p4866_p2 = scmp.lt.s32.totalorder %s5049_s19, %s5049_s19 }
  0x1e   : > { %p4859_p9 = scmp.ne.s32.totalorder %s5049_s19, %s4858_s3  ;;  %p4867_p6 = scmp.lt.s32.totalorder %s4858_s3, %s4858_s3 }
  0x20   : > { %p4861_p10 = pnand %p4859_p9, %p4847_p13  ;;  %p4868_p4 = por %p4867_p6, %p4866_p2 }
  0x22   : > { %p4862_p1 = pneg %p4861_p10 }
  0x24   : > { %p4869_p8 = pnand %p4868_p4, %p4862_p1 }
  0x26   : > { %4872 = shalt.err (!%p4869_p8)
}
  0x27   : > { %s4976_s4 = smov 128   ;;  %s4977_s5 = smov 8  }
  0x28   : > { %4787 = dma.hbm_to_vmem [thread:$0]  (!%p5056_p11), %s5496_s0, 256, %s5049_s19, [#allocation3], %s4976_s4, %s4976_s4, %s4977_s5  }
  0x29   : > { %p45_p2 = scmp.eq.s32.totalorder %s44_s23, 0  ;;  %p54_p1 = scmp.ne.s32.totalorder %s4969_s11, %s4965_s10 }
  0x2a   : > { %p55_p4 = scmp.eq.s32.totalorder %s4973_s12, 0  ;;  %p4797_p6 = scmp.lt.s32.totalorder %s4973_s12, 2 }
  0x2b   : > { %s5092_s8 = scalar_select %p45_p2, %s4969_s11, %s47_s22  }
  0x2c   : > { %p56_p8 = por %p55_p4, %p54_p1  ;;  %p5506_p10 = scmp.eq.s32.totalorder %s5026_s13, 1 }
  0x2d   : > { %s123_s18 = sand.u32 1, %s4969_s11   ;;  %s4061_s24 = sshll.u32 %s4973_s12, 7 }
  0x2e   : > { %p5096_p12 = por %p5506_p10, %p54_p1  ;;  %s4060_s25 = sshll.u32 %s123_s18, 3 }
  0x2f   : > { %s5105_s27 = scalar_lea.hbm %s5497_s1, %s4061_s24  ;;  %s127_s19 = scalar_lea.vmem [#allocation5], %s4060_s25 }
  0x30   : > { %s134_s22 = sshll.u32 %s127_s19, 4  ;;  %p5107_p11 = pnand %p4797_p6, %p56_p8  ;;  %s5111_s22 = int_to_ptr.vmem [resolvable:$true] %s134_s22 }
  0x31   : > { %s124_s28 = scalar_lea.sflag [#allocation6], %s123_s18  ;;  %s4873_s29 = scalar_lea.hbm %s5105_s27, 128 }
  0x32   : > { %p4874_p13 = scmp.ne.s32.totalorder %s5105_s27, %s4873_s29  ;;  %p4875_p0 = pneg %p5107_p11 }
  0x33   : > { %s4878_s4 = scalar_lea.hbm %s5497_s1, 256  ;;  %p4879_p7 = scmp.lt.u32.totalorder %s5105_s27, %s5497_s1 }
  0x34   : > { %p4876_p3 = pnand %p4875_p0, %p4874_p13  ;;  %p4880_p9 = scmp.lt.u32.totalorder %s4878_s4, %s4873_s29 }
  0x35   : > { %p4882_p1 = scmp.lt.u32.totalorder %s4873_s29, %s5105_s27 }
  0x36   : > { %p4877_p5 = pneg %p4876_p3  ;;  %p4881_p2 = por %p4880_p9, %p4879_p7 }
  0x38   : > { %p4883_p4 = por %p4882_p1, %p4881_p2 }
  0x3a   : > { %p4884_p6 = pnand %p4883_p4, %p4877_p5 }
  0x3c   : > { %4887 = shalt.err (!%p4884_p6)
}
  0x3d   : > { %s4888_s7 = scalar_lea.vmem %s5111_s22, 128  ;;  %s4978_s18 = smov [#allocation5]  }
  0x3e   : > { %p4889_p8 = scmp.ne.s32.totalorder %s5111_s22, %s4888_s7  ;;  %s4893_s24 = sshll.u32 %s4978_s18, 4  ;;  %s4894_s24 = int_to_ptr.vmem [resolvable:$false] %s4893_s24 }
  0x3f   : > { %s4895_s25 = scalar_lea.vmem %s4894_s24, 256  ;;  %p4896_p3 = scmp.lt.s32.totalorder %s5111_s22, %s4894_s24 }
  0x40   : > { %p4891_p10 = pnand %p4889_p8, %p4875_p0  ;;  %p4897_p7 = scmp.lt.s32.totalorder %s4895_s25, %s4888_s7 }
  0x42   : > { %p4892_p13 = pneg %p4891_p10  ;;  %p4898_p9 = por %p4897_p7, %p4896_p3 }
  0x44   : > { %p4899_p2 = pnand %p4898_p9, %p4892_p13 }
  0x46   : > { %4902 = shalt.err (!%p4899_p2)
}
  0x47   : > { %4791 = dma.hbm_to_vmem [thread:$0]  (!%p5107_p11), %s5105_s27, 128, %s5111_s22, %s124_s28  }
  0x48   : > { %p5509_p5 = scmp.ne.s32.totalorder %s5504_s17, 0 }
  0x49   : > { %p5510_p0 = scmp.eq.s32.totalorder (!%p5509_p5), %s5026_s13, 0 }
  0x4a   : > { %143 = sbr.rel (%p5509_p5) target bundleno = 732 (0x2dc), region = 28 }
  0x51   : > { %4948 = dma.done.wait (%p5510_p0), [#allocation3], 256   ;;  %p5511_p1 = pmov %p5510_p0 }
  0x52   : > { %s5145_s20 = sand.u32 1, %s4965_s10   ;;  %p5512_p4 = scmp.ne.s32.totalorder %s5502_s15, 0 }
  0x53   : > { %4950 = vsyncadd (%p5511_p1), [#allocation3], 4294967040  ;;  %s4064_s26 = sshll.u32 %s5145_s20, 3  ;;  %s150_s19 = scalar_lea.sflag [#allocation6], %s5145_s20 }
  0x54   : > { %s153_s23 = scalar_lea.vmem [#allocation5], %s4064_s26 }
  0x55   : > { %4952 = dma.done.wait (%p5512_p4), %s150_s19, 128  }
  0x56   : > { %4954 = vsyncadd (%p5512_p4), %s150_s19, 4294967168  ;;  %v4979_v0 = vmov 0.0|0.0   ;;  %vm4980_vm0 = vmmov 0   ;;  %v4981_v1 = vmov 0.0   ;;  %vm177_vm1 = vcmask 130048   ;;  %v648_v2 = vld [vmem:[%s153_s23] sm:$0xff] }
  0x57   : > { %4552 = vmatprep.subr.bf16.mxu0 %v4979_v0  ;;  %4220 = vmatprep.mubr.msk.f32.mxu0 %vm4980_vm0, %v4981_v1  ;;  %v174_v3 = vld [vmem:[#allocation2] sm:$0xff]  ;;  %v175_v4 = vld [vmem:[#allocation2 + $0x8] sm:$0xff]  ;;  %s4982_s17 = smov 112   ;;  %s4983_s15 = smov 80   ;;  %v179_v7 = vsel %vm177_vm1, %v648_v2, 0  ;;  %vm640_vm2 = vcmask 261120  }
  0x58   : > { %4570 = vmatprep.subr.bf16.mxu1 %v4979_v0  ;;  %4262 = vmatprep.mubr.msk.f32.mxu1 %vm4980_vm0, %v4981_v1  ;;  %v182_v5 = vand.u32 4294901760, %v174_v3  ;;  %v185_v6 = vand.u32 4294901760, %v175_v4  ;;  %v248_v8 = vand.u32 4294901760, %v179_v7  ;;  %s4984_s27 = smov 96   ;;  %s4985_s22 = smov 64   ;;  %vm646_vm3 = vcmask 523520  }
  0x59   : > { %650 = vrot.lane.b32.xlu0 %v648_v2, %s4982_s17  ;;  %1597 = vrot.lane.b32.xlu1 %v648_v2, %s4983_s15  ;;  %s4986_s28 = smov 48   ;;  %s4987_s29 = smov 32   ;;  %vm1117_vm4 = vcmask 785920   ;;  %vm1122_vm5 = vcmask 1048320  }
  0x5a   : > { %v5160_v9 = vpack.c.bf16 %v185_v6, %v182_v5  ;;  %v260_v10 = vsub.f32 %v174_v3, %v182_v5  ;;  %v267_v11 = vsub.f32 %v175_v4, %v185_v6  ;;  %v249_v12 = vsub.f32 %v179_v7, %v248_v8  ;;  %s4988_s30 = smov 16   ;;  %s4065_s3 = sshll.u32 %s5145_s20, 5 }
  0x5b   : > { %s5386_s4 = scalar_lea.vmem [#allocation7], %s4065_s3  ;;  %s4071_s5 = sshll.u32 %s5026_s13, 9 }
  0x5c   : > { %v261_v13 = vand.u32 4294901760, %v260_v10  ;;  %v268_v14 = vand.u32 4294901760, %v267_v11  ;;  %4554 = vmatpush3.bf16.msra.mxu0 %v5160_v9  ;;  %v250_v15 = vand.u32 4294901760, %v249_v12  ;;  %4572 = vmatpush3.bf16.msra.mxu1 %v5160_v9  ;;  %v5175_v23 = vpack.c.bf16 %v267_v11, %v260_v10  ;;  %s3974_s6 = sshll.u32 %s5386_s4, 4  ;;  %s5450_s24 = scalar_lea.hbm %s5498_s2, %s4071_s5  ;;  %s5452_s6 = int_to_ptr.vmem [resolvable:$true] %s3974_s6 }
  0x5d   : > { %1126 = vrot.lane.b32.xlu0 %v648_v2, %s4984_s27  ;;  %2071 = vrot.lane.b32.xlu1 %v648_v2, %s4985_s22  ;;  %s3960_s25 = scalar_lea.sflag [#allocation4], %s5145_s20  ;;  %s4903_s26 = scalar_lea.vmem %s5452_s6, 512 }
  0x5e   : > { %4555 = vmatprep.subr.bf16.mxu0 %v4979_v0  ;;  %v262_v16 = vsub.f32 %v260_v10, %v261_v13  ;;  %v269_v17 = vsub.f32 %v267_v11, %v268_v14  ;;  %4573 = vmatprep.subr.bf16.mxu1 %v4979_v0  ;;  %v251_v18 = vsub.f32 %v249_v12, %v250_v15  ;;  %p4904_p11 = scmp.ne.s32.totalorder %s5452_s6, %s4903_s26  ;;  %s4989_s13 = smov [#allocation7]  }
  0x5f   : > { %v5185_v24 = vpack.c.bf16 %v268_v14, %v261_v13  ;;  %s4907_s19 = sshll.u32 %s4989_s13, 4  ;;  %s4908_s19 = int_to_ptr.vmem [resolvable:$false] %s4907_s19 }
  0x60   : > { %v263_v19 = vand.u32 4294901760, %v262_v16  ;;  %v270_v20 = vand.u32 4294901760, %v269_v17  ;;  %v252_v21 = vand.u32 4294901760, %v251_v18  ;;  %p4905_p6 = pnand %p4904_p11, %p5096_p12  ;;  %s4909_s23 = scalar_lea.vmem %s4908_s19, 1024 }
  0x61   : > { %2542 = vrot.lane.b32.xlu0 %v648_v2, %s4986_s28  ;;  %3016 = vrot.lane.b32.xlu1 %v648_v2, %s4987_s29  ;;  %p4910_p10 = scmp.lt.s32.totalorder %s5452_s6, %s4908_s19  ;;  %p4911_p13 = scmp.lt.s32.totalorder %s4909_s23, %s4903_s26 }
  0x62   : > { %v5169_v22 = vpack.c.bf16 %v270_v20, %v263_v19  ;;  %4221 = vmatmul.mubr.f32.vlgmr.msra.gmra.mrb[0].mxu0 %v252_v21  ;;  %p4906_p8 = pneg %p4905_p6 }
  0x63   : > { %4227 = vmatprep.mubr.msk.f32.mxu0 %vm4980_vm0, %v4981_v1  ;;  %p4912_p3 = por %p4911_p13, %p4910_p10 }
  0x64   : > { %4557 = vmatpush3.bf16.msra.mxu0 %v5169_v22 }
  0x65   : > { %4558 = vmatprep.subr.bf16.mxu0 %v4979_v0  ;;  %3487 = vrot.lane.b32.xlu0 %v648_v2, %s4988_s30  ;;  %p4913_p7 = pnand %p4912_p3, %p4906_p8 }
  0x6a   : > { %4228 = vmatmul.mubr.f32.vlgmr.msra.gmra.mrb[0].mxu0 %v248_v8 }
  0x6b   : > { %4560 = vmatpush3.bf16.msra.mxu0 %v5175_v23  ;;  %4234 = vmatprep.mubr.msk.f32.mxu0 %vm4980_vm0, %v4981_v1 }
  0x6c   : > { %4561 = vmatprep.subr.bf16.mxu0 %v4979_v0 }
  0x72   : > { %4235 = vmatmul.mubr.f32.vlgmr.msra.gmra.mrb[0].mxu0 %v249_v12 }
  0x73   : > { %4563 = vmatpush3.bf16.msra.mxu0 %v5160_v9  ;;  %4241 = vmatprep.mubr.msk.f32.mxu0 %vm4980_vm0, %v4981_v1 }
  0x74   : > { %4564 = vmatprep.subr.bf16.mxu0 %v4979_v0 }
  0x7a   : > { %4242 = vmatmul.mubr.f32.vlgmr.msra.gmra.mrb[0].mxu0 %v250_v15 }
  0x7b   : > { %4566 = vmatpush3.bf16.msra.mxu0 %v5185_v24  ;;  %4248 = vmatprep.mubr.msk.f32.mxu0 %vm4980_vm0, %v4981_v1 }
  0x7c   : > { %4567 = vmatprep.subr.bf16.mxu0 %v4979_v0 }
  0x82   : > { %4249 = vmatmul.mubr.f32.vlgmr.msra.gmra.mrb[0].mxu0 %v248_v8 }
  0x83   : > { %4569 = vmatpush3.bf16.msra.mxu0 %v5160_v9  ;;  %4255 = vmatprep.mubr.msk.f32.mxu0 %vm4980_vm0, %v4981_v1 }
  0x84   : > { %4588 = vmatprep.subr.bf16.mxu0 %v4979_v0 }
  0x8a   : > { %4256 = vmatmul.mubr.f32.vlgmr.msra.gmra.mrb[0].mxu0 %v248_v8 }
  0x8b   : > { %4590 = vmatpush3.bf16.msra.mxu0 %v5160_v9  ;;  %4304 = vmatprep.mubr.msk.f32.mxu0 %vm4980_vm0, %v4981_v1 }
  0x8c   : > { %4591 = vmatprep.subr.bf16.mxu0 %v4979_v0 }
  0xcb   : > { %v651_v25 = vpop.permute.xlu0 %650  ;;  %v1598_v39 = vpop.permute.xlu1 %1597 }
  0xcc   : > { %v652_v26 = vsel %vm177_vm1, %v651_v25, 0  ;;  %v1599_v41 = vsel %vm177_vm1, %v1598_v39, 0 }
  0xcd   : > { %v5200_v27 = vand.u32 4294901760, %v652_v26  ;;  %v5238_v43 = vand.u32 4294901760, %v1599_v41 }
  0xcf   : > { %v722_v28 = vsub.f32 %v652_v26, %v5200_v27  ;;  %v1127_v29 = vpop.permute.xlu0 %1126  ;;  %v2072_v40 = vpop.permute.xlu1 %2071  ;;  %v1669_v45 = vsub.f32 %v1599_v41, %v5238_v43 }
  0xd0   : > { %v1128_v30 = vsel %vm177_vm1, %v1127_v29, 0  ;;  %v2073_v42 = vsel %vm177_vm1, %v2072_v40, 0 }
  0xd1   : > { %v723_v31 = vand.u32 4294901760, %v722_v28  ;;  %v5204_v32 = vand.u32 4294901760, %v1128_v30  ;;  %v5241_v44 = vand.u32 4294901760, %v2073_v42  ;;  %v1670_v47 = vand.u32 4294901760, %v1669_v45 }
  0xd3   : > { %v1198_v33 = vsub.f32 %v1128_v30, %v5204_v32  ;;  %v724_v34 = vsub.f32 %v722_v28, %v723_v31  ;;  %v2143_v46 = vsub.f32 %v2073_v42, %v5241_v44  ;;  %v1671_v49 = vsub.f32 %v1669_v45, %v1670_v47  ;;  %v2543_v53 = vpop.permute.xlu0 %2542  ;;  %v3017_v54 = vpop.permute.xlu1 %3016 }
  0xd4   : > { %v2544_v55 = vsel %vm177_vm1, %v2543_v53, 0  ;;  %v3018_v56 = vsel %vm177_vm1, %v3017_v54, 0 }
  0xd5   : > { %v1199_v35 = vand.u32 4294901760, %v1198_v33  ;;  %v725_v36 = vand.u32 4294901760, %v724_v34  ;;  %v2144_v48 = vand.u32 4294901760, %v2143_v46  ;;  %v1672_v51 = vand.u32 4294901760, %v1671_v49 }
  0xd6   : > { %v5300_v57 = vand.u32 4294901760, %v2544_v55  ;;  %v5303_v58 = vand.u32 4294901760, %v3018_v56 }
  0xd7   : > { %v1200_v37 = vsub.f32 %v1198_v33, %v1199_v35  ;;  %4263 = vmatmul.mubr.f32.vlgmr.msra.gmra.mrb[0].mxu1 %v725_v36  ;;  %v2145_v50 = vsub.f32 %v2143_v46, %v2144_v48  ;;  %v3488_v5 = vpop.permute.xlu0 %3487 }
  0xd8   : > { %4575 = vmatpush3.bf16.msra.mxu1 %v5169_v22  ;;  %4269 = vmatprep.mubr.msk.f32.mxu1 %vm4980_vm0, %v4981_v1  ;;  %v2614_v59 = vsub.f32 %v2544_v55, %v5300_v57  ;;  %v3088_v60 = vsub.f32 %v3018_v56, %v5303_v58  ;;  %v3489_v6 = vsel %vm177_vm1, %v3488_v5, 0 }
  0xd9   : > { %v1201_v38 = vand.u32 4294901760, %v1200_v37  ;;  %4576 = vmatprep.subr.bf16.mxu1 %v4979_v0  ;;  %v2146_v52 = vand.u32 4294901760, %v2145_v50  ;;  %v3558_v7 = vand.u32 4294901760, %v3489_v6 }
  0xda   : > { %v2615_v61 = vand.u32 4294901760, %v2614_v59  ;;  %v3089_v62 = vand.u32 4294901760, %v3088_v60 }
  0xdb   : > { %4305 = vmatmul.mubr.f32.vlgmr.msra.gmra.mrb[2].mxu0 %v1201_v38  ;;  %v3559_v8 = vsub.f32 %v3489_v6, %v3558_v7 }
  0xdc   : > { %4593 = vmatpush3.bf16.msra.mxu0 %v5169_v22  ;;  %4311 = vmatprep.mubr.msk.f32.mxu0 %vm4980_vm0, %v4981_v1  ;;  %v2616_v63 = vsub.f32 %v2614_v59, %v2615_v61  ;;  %v3090_v2 = vsub.f32 %v3088_v60, %v3089_v62 }
  0xdd   : > { %4594 = vmatprep.subr.bf16.mxu0 %v4979_v0  ;;  %v3560_v10 = vand.u32 4294901760, %v3559_v8 }
  0xde   : > { %v2617_v3 = vand.u32 4294901760, %v2616_v63  ;;  %v3091_v4 = vand.u32 4294901760, %v3090_v2 }
  0xdf   : > { %4270 = vmatmul.mubr.f32.vlgmr.msra.gmra.mrb[0].mxu1 %v5200_v27  ;;  %v3561_v11 = vsub.f32 %v3559_v8, %v3560_v10 }
  0xe0   : > { %4578 = vmatpush3.bf16.msra.mxu1 %v5175_v23  ;;  %4276 = vmatprep.mubr.msk.f32.mxu1 %vm4980_vm0, %v4981_v1 }
  0xe1   : > { %4579 = vmatprep.subr.bf16.mxu1 %v4979_v0  ;;  %v3562_v12 = vand.u32 4294901760, %v3561_v11 }
  0xe3   : > { %4312 = vmatmul.mubr.f32.vlgmr.msra.gmra.mrb[2].mxu0 %v5204_v32 }
  0xe4   : > { %4596 = vmatpush3.bf16.msra.mxu0 %v5175_v23  ;;  %4318 = vmatprep.mubr.msk.f32.mxu0 %vm4980_vm0, %v4981_v1 }
  0xe5   : > { %4597 = vmatprep.subr.bf16.mxu0 %v4979_v0 }
  0xe7   : > { %4277 = vmatmul.mubr.f32.vlgmr.msra.gmra.mrb[0].mxu1 %v722_v28 }
  0xe8   : > { %4581 = vmatpush3.bf16.msra.mxu1 %v5160_v9  ;;  %4283 = vmatprep.mubr.msk.f32.mxu1 %vm4980_vm0, %v4981_v1 }
  0xe9   : > { %4582 = vmatprep.subr.bf16.mxu1 %v4979_v0 }
  0xeb   : > { %4319 = vmatmul.mubr.f32.vlgmr.msra.gmra.mrb[2].mxu0 %v1198_v33 }
  0xec   : > { %4599 = vmatpush3.bf16.msra.mxu0 %v5160_v9  ;;  %4325 = vmatprep.mubr.msk.f32.mxu0 %vm4980_vm0, %v4981_v1 }
  0xed   : > { %4600 = vmatprep.subr.bf16.mxu0 %v4979_v0 }
  0xef   : > { %4284 = vmatmul.mubr.f32.vlgmr.msra.gmra.mrb[0].mxu1 %v723_v31 }
  0xf0   : > { %4584 = vmatpush3.bf16.msra.mxu1 %v5185_v24  ;;  %4290 = vmatprep.mubr.msk.f32.mxu1 %vm4980_vm0, %v4981_v1 }
  0xf1   : > { %4585 = vmatprep.subr.bf16.mxu1 %v4979_v0 }
  0xf3   : > { %4326 = vmatmul.mubr.f32.vlgmr.msra.gmra.mrb[2].mxu0 %v1199_v35 }
  0xf4   : > { %4602 = vmatpush3.bf16.msra.mxu0 %v5185_v24  ;;  %4332 = vmatprep.mubr.msk.f32.mxu0 %vm4980_vm0, %v4981_v1 }
  0xf5   : > { %4603 = vmatprep.subr.bf16.mxu0 %v4979_v0 }
  0xf7   : > { %4291 = vmatmul.mubr.f32.vlgmr.msra.gmra.mrb[0].mxu1 %v5200_v27 }
  0xf8   : > { %4587 = vmatpush3.bf16.msra.mxu1 %v5160_v9  ;;  %4297 = vmatprep.mubr.msk.f32.mxu1 %vm4980_vm0, %v4981_v1 }
  0xf9   : > { %4606 = vmatprep.subr.bf16.mxu1 %v4979_v0 }
  0xfb   : > { %4333 = vmatmul.mubr.f32.vlgmr.msra.gmra.mrb[2].mxu0 %v5204_v32 }
  0xfc   : > { %4605 = vmatpush3.bf16.msra.mxu0 %v5160_v9  ;;  %4339 = vmatprep.mubr.msk.f32.mxu0 %vm4980_vm0, %v4981_v1 }
  0xfd   : > { %4624 = vmatprep.subr.bf16.mxu0 %v4979_v0 }
  0xff   : > { %4298 = vmatmul.mubr.f32.vlgmr.msra.gmra.mrb[0].mxu1 %v5200_v27 }
 0x100   : > { %4608 = vmatpush3.bf16.msra.mxu1 %v5160_v9  ;;  %4346 = vmatprep.mubr.msk.f32.mxu1 %vm4980_vm0, %v4981_v1 }
 0x101   : > { %4609 = vmatprep.subr.bf16.mxu1 %v4979_v0 }
 0x103   : > { %4340 = vmatmul.mubr.f32.vlgmr.msra.gmra.mrb[2].mxu0 %v5204_v32  ;;  %4347 = vmatmul.mubr.f32.vlgmr.msra.gmra.mrb[2].mxu1 %v1672_v51 }
 0x104   : > { %4611 = vmatpush3.bf16.msra.mxu1 %v5169_v22  ;;  %4626 = vmatpush3.bf16.msra.mxu0 %v5160_v9 }
 0x105   : > { %4388 = vmatprep.mubr.msk.f32.mxu0 %vm4980_vm0, %v4981_v1  ;;  %4353 = vmatprep.mubr.msk.f32.mxu1 %vm4980_vm0, %v4981_v1 }
 0x106   : > { %4612 = vmatprep.subr.bf16.mxu1 %v4979_v0  ;;  %4627 = vmatprep.subr.bf16.mxu0 %v4979_v0 }
 0x107   : > { %4389 = vmatmul.mubr.f32.vlgmr.msra.gmra.mrb[4].mxu0 %v2146_v52 }
 0x108   : > { %4629 = vmatpush3.bf16.msra.mxu0 %v5169_v22  ;;  %4395 = vmatprep.mubr.msk.f32.mxu0 %vm4980_vm0, %v4981_v1 }
 0x109   : > { %4630 = vmatprep.subr.bf16.mxu0 %v4979_v0 }
 0x10b   : > { %4354 = vmatmul.mubr.f32.vlgmr.msra.gmra.mrb[2].mxu1 %v5238_v43 }
 0x10c   : > { %4614 = vmatpush3.bf16.msra.mxu1 %v5175_v23  ;;  %4360 = vmatprep.mubr.msk.f32.mxu1 %vm4980_vm0, %v4981_v1 }
 0x10d   : > { %4615 = vmatprep.subr.bf16.mxu1 %v4979_v0 }
 0x10f   : > { %4396 = vmatmul.mubr.f32.vlgmr.msra.gmra.mrb[4].mxu0 %v5241_v44 }
 0x110   : > { %4632 = vmatpush3.bf16.msra.mxu0 %v5175_v23  ;;  %4402 = vmatprep.mubr.msk.f32.mxu0 %vm4980_vm0, %v4981_v1 }
 0x111   : > { %4633 = vmatprep.subr.bf16.mxu0 %v4979_v0 }
 0x113   : > { %4361 = vmatmul.mubr.f32.vlgmr.msra.gmra.mrb[2].mxu1 %v1669_v45 }
 0x114   : > { %4617 = vmatpush3.bf16.msra.mxu1 %v5160_v9  ;;  %4367 = vmatprep.mubr.msk.f32.mxu1 %vm4980_vm0, %v4981_v1 }
 0x115   : > { %4618 = vmatprep.subr.bf16.mxu1 %v4979_v0 }
 0x117   : > { %4403 = vmatmul.mubr.f32.vlgmr.msra.gmra.mrb[4].mxu0 %v2143_v46 }
 0x118   : > { %4635 = vmatpush3.bf16.msra.mxu0 %v5160_v9  ;;  %4409 = vmatprep.mubr.msk.f32.mxu0 %vm4980_vm0, %v4981_v1 }
 0x119   : > { %4636 = vmatprep.subr.bf16.mxu0 %v4979_v0 }
 0x11b   : > { %4368 = vmatmul.mubr.f32.vlgmr.msra.gmra.mrb[2].mxu1 %v1670_v47 }
 0x11c   : > { %4620 = vmatpush3.bf16.msra.mxu1 %v5185_v24  ;;  %4374 = vmatprep.mubr.msk.f32.mxu1 %vm4980_vm0, %v4981_v1 }
 0x11d   : > { %4621 = vmatprep.subr.bf16.mxu1 %v4979_v0 }
 0x11f   : > { %4410 = vmatmul.mubr.f32.vlgmr.msra.gmra.mrb[4].mxu0 %v2144_v48 }
 0x120   : > { %4638 = vmatpush3.bf16.msra.mxu0 %v5185_v24  ;;  %4416 = vmatprep.mubr.msk.f32.mxu0 %vm4980_vm0, %v4981_v1 }
 0x121   : > { %4639 = vmatprep.subr.bf16.mxu0 %v4979_v0 }
 0x123   : > { %4375 = vmatmul.mubr.f32.vlgmr.msra.gmra.mrb[2].mxu1 %v5238_v43 }
 0x124   : > { %4623 = vmatpush3.bf16.msra.mxu1 %v5160_v9  ;;  %4381 = vmatprep.mubr.msk.f32.mxu1 %vm4980_vm0, %v4981_v1 }
 0x125   : > { %4642 = vmatprep.subr.bf16.mxu1 %v4979_v0 }
 0x127   : > { %4417 = vmatmul.mubr.f32.vlgmr.msra.gmra.mrb[4].mxu0 %v5241_v44 }
 0x128   : > { %4641 = vmatpush3.bf16.msra.mxu0 %v5160_v9  ;;  %4423 = vmatprep.mubr.msk.f32.mxu0 %vm4980_vm0, %v4981_v1 }
 0x129   : > { %4660 = vmatprep.subr.bf16.mxu0 %v4979_v0 }
 0x12b   : > { %4382 = vmatmul.mubr.f32.vlgmr.msra.gmra.mrb[2].mxu1 %v5238_v43 }
 0x12c   : > { %4644 = vmatpush3.bf16.msra.mxu1 %v5160_v9  ;;  %4430 = vmatprep.mubr.msk.f32.mxu1 %vm4980_vm0, %v4981_v1 }
 0x12d   : > { %4645 = vmatprep.subr.bf16.mxu1 %v4979_v0 }
 0x12f   : > { %4424 = vmatmul.mubr.f32.vlgmr.msra.gmra.mrb[4].mxu0 %v5241_v44  ;;  %4431 = vmatmul.mubr.f32.vlgmr.msra.gmra.mrb[4].mxu1 %v2617_v3 }
 0x130   : > { %4647 = vmatpush3.bf16.msra.mxu1 %v5169_v22  ;;  %4662 = vmatpush3.bf16.msra.mxu0 %v5160_v9 }
 0x131   : > { %4472 = vmatprep.mubr.msk.f32.mxu0 %vm4980_vm0, %v4981_v1  ;;  %4437 = vmatprep.mubr.msk.f32.mxu1 %vm4980_vm0, %v4981_v1 }
 0x132   : > { %4648 = vmatprep.subr.bf16.mxu1 %v4979_v0  ;;  %4663 = vmatprep.subr.bf16.mxu0 %v4979_v0 }
 0x133   : > { %4473 = vmatmul.mubr.f32.vlgmr.msra.gmra.mrb[6].mxu0 %v3091_v4 }
 0x134   : > { %4665 = vmatpush3.bf16.msra.mxu0 %v5169_v22  ;;  %4479 = vmatprep.mubr.msk.f32.mxu0 %vm4980_vm0, %v4981_v1 }
 0x135   : > { %4666 = vmatprep.subr.bf16.mxu0 %v4979_v0 }
 0x137   : > { %4438 = vmatmul.mubr.f32.vlgmr.msra.gmra.mrb[4].mxu1 %v5300_v57 }
 0x138   : > { %4650 = vmatpush3.bf16.msra.mxu1 %v5175_v23  ;;  %4444 = vmatprep.mubr.msk.f32.mxu1 %vm4980_vm0, %v4981_v1 }
 0x139   : > { %4651 = vmatprep.subr.bf16.mxu1 %v4979_v0 }
 0x13b   : > { %4480 = vmatmul.mubr.f32.vlgmr.msra.gmra.mrb[6].mxu0 %v5303_v58 }
 0x13c   : > { %4668 = vmatpush3.bf16.msra.mxu0 %v5175_v23  ;;  %4486 = vmatprep.mubr.msk.f32.mxu0 %vm4980_vm0, %v4981_v1 }
 0x13d   : > { %4669 = vmatprep.subr.bf16.mxu0 %v4979_v0 }
 0x13f   : > { %4445 = vmatmul.mubr.f32.vlgmr.msra.gmra.mrb[4].mxu1 %v2614_v59 }
 0x140   : > { %4653 = vmatpush3.bf16.msra.mxu1 %v5160_v9  ;;  %4451 = vmatprep.mubr.msk.f32.mxu1 %vm4980_vm0, %v4981_v1 }
 0x141   : > { %4654 = vmatprep.subr.bf16.mxu1 %v4979_v0 }
 0x143   : > { %4487 = vmatmul.mubr.f32.vlgmr.msra.gmra.mrb[6].mxu0 %v3088_v60 }
 0x144   : > { %4671 = vmatpush3.bf16.msra.mxu0 %v5160_v9  ;;  %4493 = vmatprep.mubr.msk.f32.mxu0 %vm4980_vm0, %v4981_v1 }
 0x145   : > { %4672 = vmatprep.subr.bf16.mxu0 %v4979_v0 }
 0x147   : > { %4452 = vmatmul.mubr.f32.vlgmr.msra.gmra.mrb[4].mxu1 %v2615_v61 }
 0x148   : > { %4656 = vmatpush3.bf16.msra.mxu1 %v5185_v24  ;;  %4458 = vmatprep.mubr.msk.f32.mxu1 %vm4980_vm0, %v4981_v1 }
 0x149   : > { %4657 = vmatprep.subr.bf16.mxu1 %v4979_v0 }
 0x14b   : > { %4494 = vmatmul.mubr.f32.vlgmr.msra.gmra.mrb[6].mxu0 %v3089_v62 }
 0x14c   : > { %4674 = vmatpush3.bf16.msra.mxu0 %v5185_v24  ;;  %4500 = vmatprep.mubr.msk.f32.mxu0 %vm4980_vm0, %v4981_v1 }
 0x14d   : > { %4675 = vmatprep.subr.bf16.mxu0 %v4979_v0 }
 0x14f   : > { %4459 = vmatmul.mubr.f32.vlgmr.msra.gmra.mrb[4].mxu1 %v5300_v57 }
 0x150   : > { %4659 = vmatpush3.bf16.msra.mxu1 %v5160_v9  ;;  %4465 = vmatprep.mubr.msk.f32.mxu1 %vm4980_vm0, %v4981_v1 }
 0x151   : > { %4678 = vmatprep.subr.bf16.mxu1 %v4979_v0 }
 0x153   : > { %4501 = vmatmul.mubr.f32.vlgmr.msra.gmra.mrb[6].mxu0 %v5303_v58 }
 0x154   : > { %4677 = vmatpush3.bf16.msra.mxu0 %v5160_v9  ;;  %4507 = vmatprep.mubr.msk.f32.mxu0 %vm4980_vm0, %v4981_v1 }
 0x157   : > { %4466 = vmatmul.mubr.f32.vlgmr.msra.gmra.mrb[4].mxu1 %v5300_v57 }
 0x158   : > { %4680 = vmatpush3.bf16.msra.mxu1 %v5160_v9  ;;  %4514 = vmatprep.mubr.msk.f32.mxu1 %vm4980_vm0, %v4981_v1 }
 0x159   : > { %4681 = vmatprep.subr.bf16.mxu1 %v4979_v0 }
 0x15b   : > { %4508 = vmatmul.mubr.f32.vlgmr.msra.gmra.mrb[6].mxu0 %v5303_v58  ;;  %4515 = vmatmul.mubr.f32.vlgmr.msra.gmra.mrb[6].mxu1 %v3562_v12 }
 0x15c   : > { %4683 = vmatpush3.bf16.msra.mxu1 %v5169_v22  ;;  %4521 = vmatprep.mubr.msk.f32.mxu1 %vm4980_vm0, %v4981_v1 }
 0x15d   : > { %4684 = vmatprep.subr.bf16.mxu1 %v4979_v0  ;;  %v636_v13 = vpop.f32.mrb[0].mxu0 }
 0x15e   : > { %641 = vst.msk [vmem:[%s5386_s4] sm:$0xff] %vm640_vm2, %v636_v13  ;;  %v4257_v14 = vpop.f32.mrb[1].mxu0  ;;  %643 = vrot.lane.b32.xlu1 %v636_v13, %s4987_s29 }
 0x163   : > { %4522 = vmatmul.mubr.f32.vlgmr.msra.gmra.mrb[6].mxu1 %v3558_v7 }
 0x164   : > { %4686 = vmatpush3.bf16.msra.mxu1 %v5175_v23  ;;  %4528 = vmatprep.mubr.msk.f32.mxu1 %vm4980_vm0, %v4981_v1 }
 0x165   : > { %4687 = vmatprep.subr.bf16.mxu1 %v4979_v0 }
 0x16b   : > { %4529 = vmatmul.mubr.f32.vlgmr.msra.gmra.mrb[6].mxu1 %v3559_v8 }
 0x16c   : > { %4689 = vmatpush3.bf16.msra.mxu1 %v5160_v9  ;;  %4535 = vmatprep.mubr.msk.f32.mxu1 %vm4980_vm0, %v4981_v1 }
 0x16d   : > { %4690 = vmatprep.subr.bf16.mxu1 %v4979_v0 }
 0x173   : > { %4536 = vmatmul.mubr.f32.vlgmr.msra.gmra.mrb[6].mxu1 %v3560_v10 }
 0x174   : > { %4692 = vmatpush3.bf16.msra.mxu1 %v5185_v24  ;;  %4542 = vmatprep.mubr.msk.f32.mxu1 %vm4980_vm0, %v4981_v1 }
 0x175   : > { %4693 = vmatprep.subr.bf16.mxu1 %v4979_v0 }
 0x17b   : > { %4543 = vmatmul.mubr.f32.vlgmr.msra.gmra.mrb[6].mxu1 %v3558_v7 }
 0x17c   : > { %4695 = vmatpush3.bf16.msra.mxu1 %v5160_v9  ;;  %4549 = vmatprep.mubr.msk.f32.mxu1 %vm4980_vm0, %v4981_v1 }
 0x183   : > { %4550 = vmatmul.mubr.f32.vlgmr.msra.gmra.mrb[6].mxu1 %v3558_v7 }
 0x1d0   : > { %v644_v16 = vpop.permute.xlu1 %643 }
 0x1d1   : > { %647 = vst.msk [vmem:[%s5386_s4] sm:$0xff] %vm646_vm3, %v644_v16 }
 0x1d2   : > { %v1109_v15 = vpop.f32.mrb[0].mxu1 }
 0x1d3   : > { %v4299_v17 = vpop.f32.mrb[1].mxu1  ;;  %1114 = vrot.lane.b32.xlu1 %v1109_v15, %s4985_s22 }
 0x1d6   : > { %v1585_v18 = vpop.f32.mrb[2].mxu0 }
 0x1d7   : > { %1589 = vst.msk [vmem:[%s5386_s4 + $0x8] sm:$0xff] %vm640_vm2, %v1585_v18  ;;  %1119 = vrot.lane.b32.xlu1 %v1109_v15, %s4984_s27  ;;  %1591 = vrot.lane.b32.xlu0 %v1585_v18, %s4987_s29  ;;  %v4341_v0 = vpop.f32.mrb[3].mxu0 }
 0x1fe   : > { %v2056_v1 = vpop.f32.mrb[2].mxu1 }
 0x1ff   : > { %v4383_v9 = vpop.f32.mrb[3].mxu1  ;;  %2061 = vrot.lane.b32.xlu0 %v2056_v1, %s4985_s22 }
 0x202   : > { %v2530_v19 = vpop.f32.mrb[4].mxu0 }
 0x203   : > { %2534 = vst.msk [vmem:[%s5386_s4 + $0x10] sm:$0xff] %vm640_vm2, %v2530_v19  ;;  %2065 = vrot.lane.b32.xlu0 %v2056_v1, %s4984_s27  ;;  %2536 = vrot.lane.b32.xlu1 %v2530_v19, %s4987_s29  ;;  %v4425_v20 = vpop.f32.mrb[5].mxu0 }
 0x22a   : > { %v3001_v21 = vpop.f32.mrb[4].mxu1 }
 0x22b   : > { %v4467_v22 = vpop.f32.mrb[5].mxu1  ;;  %3006 = vrot.lane.b32.xlu1 %v3001_v21, %s4985_s22 }
 0x22e   : > { %v3475_v23 = vpop.f32.mrb[6].mxu0 }
 0x22f   : > { %3479 = vst.msk [vmem:[%s5386_s4 + $0x18] sm:$0xff] %vm640_vm2, %v3475_v23  ;;  %3010 = vrot.lane.b32.xlu1 %v3001_v21, %s4984_s27  ;;  %3481 = vrot.lane.b32.xlu0 %v3475_v23, %s4987_s29  ;;  %v4509_v24 = vpop.f32.mrb[7].mxu0 }
 0x245   : > { %v1115_v25 = vpop.permute.xlu1 %1114 }
 0x246   : > { %1118 = vst.msk [vmem:[%s5386_s4] sm:$0xff] %vm1117_vm4, %v1115_v25 }
 0x249   : > { %v1120_v26 = vpop.permute.xlu1 %1119  ;;  %v1592_v27 = vpop.permute.xlu0 %1591 }
 0x24a   : > { %1123 = vst.msk [vmem:[%s5386_s4] sm:$0xff] %vm1122_vm5, %v1120_v26 }
 0x24b   : > { %1594 = vst.msk [vmem:[%s5386_s4 + $0x8] sm:$0xff] %vm646_vm3, %v1592_v27 }
 0x256   : > { %v3946_v28 = vpop.f32.mrb[6].mxu1 }
 0x257   : > { %v4551_v29 = vpop.f32.mrb[7].mxu1  ;;  %3951 = vrot.lane.b32.xlu0 %v3946_v28, %s4985_s22 }
 0x25b   : > { %3955 = vrot.lane.b32.xlu0 %v3946_v28, %s4984_s27 }
 0x271   : > { %v2062_v30 = vpop.permute.xlu0 %2061 }
 0x272   : > { %2064 = vst.msk [vmem:[%s5386_s4 + $0x8] sm:$0xff] %vm1117_vm4, %v2062_v30 }
 0x275   : > { %v2066_v31 = vpop.permute.xlu0 %2065  ;;  %v2537_v32 = vpop.permute.xlu1 %2536 }
 0x276   : > { %2068 = vst.msk [vmem:[%s5386_s4 + $0x8] sm:$0xff] %vm1122_vm5, %v2066_v31 }
 0x277   : > { %2539 = vst.msk [vmem:[%s5386_s4 + $0x10] sm:$0xff] %vm646_vm3, %v2537_v32 }
 0x29d   : > { %v3007_v33 = vpop.permute.xlu1 %3006 }
 0x29e   : > { %3009 = vst.msk [vmem:[%s5386_s4 + $0x10] sm:$0xff] %vm1117_vm4, %v3007_v33 }
 0x2a1   : > { %v3011_v34 = vpop.permute.xlu1 %3010  ;;  %v3482_v35 = vpop.permute.xlu0 %3481 }
 0x2a2   : > { %3013 = vst.msk [vmem:[%s5386_s4 + $0x10] sm:$0xff] %vm1122_vm5, %v3011_v34 }
 0x2a3   : > { %3484 = vst.msk [vmem:[%s5386_s4 + $0x18] sm:$0xff] %vm646_vm3, %v3482_v35 }
 0x2c9   : > { %v3952_v36 = vpop.permute.xlu0 %3951 }
 0x2ca   : > { %3954 = vst.msk [vmem:[%s5386_s4 + $0x18] sm:$0xff] %vm1117_vm4, %v3952_v36 }
 0x2cd   : > { %v3956_v37 = vpop.permute.xlu0 %3955 }
 0x2ce   : > { %3958 = vst.msk [vmem:[%s5386_s4 + $0x18] sm:$0xff] %vm1122_vm5, %v3956_v37 }
 0x2cf   : > { %4916 = shalt.err (!%p4913_p7)
}
 0x2d0   : > { %s4917_s20 = scalar_lea.hbm %s5450_s24, 512  ;;  %s4921_s27 = scalar_lea.hbm %s5498_s2, 1024 }
 0x2d1   : > { %p4918_p9 = scmp.ne.s32.totalorder %s5450_s24, %s4917_s20  ;;  %p4922_p0 = scmp.lt.u32.totalorder %s5450_s24, %s5498_s2 }
 0x2d2   : > { %p4923_p1 = scmp.lt.u32.totalorder %s4921_s27, %s4917_s20  ;;  %p4925_p11 = scmp.lt.u32.totalorder %s4917_s20, %s5450_s24 }
 0x2d3   : > { %p4919_p2 = pnand %p4918_p9, %p5096_p12 }
 0x2d4   : > { %p4924_p4 = por %p4923_p1, %p4922_p0 }
 0x2d5   : > { %p4920_p5 = pneg %p4919_p2 }
 0x2d6   : > { %p4926_p6 = por %p4925_p11, %p4924_p4 }
 0x2d8   : > { %p4927_p8 = pnand %p4926_p6, %p4920_p5 }
 0x2da   : > { %4930 = shalt.err (!%p4927_p8)
}
 0x2db   : > { %4782 = dma.vmem_to_hbm [thread:$0]  (%p5096_p12), %s5452_s6, 512, %s5450_s24, %s3960_s25  }
 0x2dc PF: > { %s3986_s29 = sand.u32 1, %s4961_s9   ;;  %p5513_p10 = scmp.ne.s32.totalorder %s5503_s16, 0 }
 0x2dd   : > { %p5514_p13 = scmp.ge.s32.totalorder %s4973_s12, 2  ;;  %s3987_s30 = scalar_lea.sflag [#allocation4], %s3986_s29 }
 0x2df   : > { %p4793_p3 = pnand %p5514_p13, %p5513_p10 }
 0x2e1   : > { %4956 = dma.done.wait (!%p4793_p3), %s3987_s30, 512  }
 0x2e2   : > { %4958 = vsyncadd (!%p4793_p3), %s3987_s30, 4294966784  ;;  %p16_p7 = scmp.ge.s32.totalorder %s5061_s21, 4   ;;  %s5515_s9 = smov %s4965_s10 }
 0x2e3   : > { %s5516_s10 = smov %s4969_s11  ;;  %s5517_s11 = smov %s5092_s8 }
 0x2e4   : > { %s5518_s12 = smov %s5061_s21  ;;  %18 = sbr.rel (!%p16_p7) target bundleno = 6 (0x6), region = 78 }
 0x2eb   :  { %3992 = vsyncpa [#allocation3], 1 }
 0x2ec   :  { %3994 = vsyncpa [#allocation3 + $0x1], 1 }
 0x2ed   :  { %3995 = vsyncpa [#allocation6], 1 }
 0x2ee   :  { %3997 = vsyncpa [#allocation6 + $0x1], 1 }
 0x2ef   :  { %3998 = vsyncpa [#allocation4], 1 }
 0x2f0   :  { %4000 = vsyncpa [#allocation4 + $0x1], 1 }

// kernel: tpu_custom_call.1
= control target key start
LH: loop header
LB: loop body
LE: loop exit
PB: predicated region body
PF: predicated region fallthrough
CT: control target
= control target key end

     0   :  { %7 = vsyncpa [#allocation3], 0  ;;  %s5496_s0 = inlined_call_operand.hbm [shape: f32[16,32], index: 0, kind: input, shape index: {}]   ;;  %s5497_s1 = inlined_call_operand.hbm [shape: f32[16,128], index: 1, kind: input, shape index: {}]   ;;  %s5498_s2 = inlined_call_operand.hbm [shape: f32[16,512], index: 2, kind: output, shape index: {}]  }
   0x1   :  { %8 = vsyncpa [#allocation6], 0 }
   0x2   :  { %10 = vsyncpa [#allocation6 + $0x1], 0 }
   0x3   :  { %11 = vsyncpa [#allocation4], 0 }
   0x4   :  { %13 = vsyncpa [#allocation4 + $0x1], 0  ;;  %s5005_s9 = smov 0   ;;  %s5007_s10 = smov 0  }
   0x5   :  { %s5009_s11 = smov 0   ;;  %s5011_s12 = smov 0  }
   0x6 LB: > { %s5026_s13 = sadd.s32 4294967295, %s4973_s12   ;;  %s4056_s14 = sadd.s32 4294967294, %s4973_s12   ;;  %s4973_s12 = sphi %s5011_s12, %s5518_s12   ;;  %s4969_s11 = sphi %s5009_s11, %s5517_s11   ;;  %s4965_s10 = sphi %s5007_s10, %s5516_s10   ;;  %s4961_s9 = sphi %s5005_s9, %s5515_s9  }
   0x7   : > { %p60_p0 = scmp.ne.s32.totalorder %s4965_s10, %s4961_s9  ;;  %p5499_p1 = scmp.eq.s32.totalorder %s5026_s13, 0 }
   0x8   : > { %p90_p3 = scmp.eq.s32.totalorder %s4056_s14, 1  ;;  %p4057_p5 = scmp.ge.s32.totalorder %s4973_s12, 1 }
   0x9   : > { %p5035_p4 = por %p5499_p1, %p60_p0  ;;  %p97_p7 = scmp.lt.s32.totalorder %s4973_s12, 3 }
   0xa   : > { %p5040_p6 = por %p90_p3, %p60_p0  ;;  %s4975_s18 = smov [#allocation2]  }
   0xb   : > { %s5502_s15 = scalar_select %p5035_p4, 1, 0 }
   0xc   : > { %s5503_s16 = scalar_select %p5040_p6, 1, 0 }
   0xd   : > { %p5045_p8 = pnand %p4057_p5, %p97_p7  ;;  %s109_s19 = sshll.u32 %s4975_s18, 4  ;;  %s5049_s19 = int_to_ptr.vmem [resolvable:$true] %s109_s19 }
   0xe   : > { %s5061_s21 = sadd.s32 1, %s4973_s12   ;;  %s47_s22 = sadd.s32 1, %s4969_s11 }
   0xf   : > { %s5504_s17 = scalar_select %p5045_p8, 1, 0 }
  0x10   : > { %p4784_p9 = pneg %p5045_p8  ;;  %s44_s23 = ssub.s32 %s4973_s12, %s5061_s21 }
  0x11   : > { %s4845_s26 = scalar_lea.hbm %s5496_s0, 256 }
  0x12   : > { %p5056_p11 = pnand %p4784_p9, %p5499_p1  ;;  %p4846_p12 = scmp.ne.s32.totalorder %s5496_s0, %s4845_s26 }
  0x13   : > { %p4852_p5 = scmp.lt.u32.totalorder %s4845_s26, %s5496_s0 }
  0x14   : > { %p4847_p13 = pneg %p5056_p11 }
  0x16   : > { %p4848_p0 = pnand %p4847_p13, %p4846_p12 }
  0x18   : > { %p4849_p3 = pneg %p4848_p0 }
  0x1a   : > { %p4854_p7 = pnand %p4852_p5, %p4849_p3 }
  0x1c   : > { %4857 = shalt.err (!%p4854_p7)
}
  0x1d   : > { %s4858_s3 = scalar_lea.vmem %s5049_s19, 256  ;;  %p4866_p2 = scmp.lt.s32.totalorder %s5049_s19, %s5049_s19 }
  0x1e   : > { %p4859_p9 = scmp.ne.s32.totalorder %s5049_s19, %s4858_s3  ;;  %p4867_p6 = scmp.lt.s32.totalorder %s4858_s3, %s4858_s3 }
  0x20   : > { %p4861_p10 = pnand %p4859_p9, %p4847_p13  ;;  %p4868_p4 = por %p4867_p6, %p4866_p2 }
  0x22   : > { %p4862_p1 = pneg %p4861_p10 }
  0x24   : > { %p4869_p8 = pnand %p4868_p4, %p4862_p1 }
  0x26   : > { %4872 = shalt.err (!%p4869_p8)
}
  0x27   : > { %s4976_s4 = smov 128   ;;  %s4977_s5 = smov 8  }
  0x28   : > { %4787 = dma.hbm_to_vmem [thread:$0]  (!%p5056_p11), %s5496_s0, 256, %s5049_s19, [#allocation3], %s4976_s4, %s4976_s4, %s4977_s5  }
  0x29   : > { %p45_p2 = scmp.eq.s32.totalorder %s44_s23, 0  ;;  %p54_p1 = scmp.ne.s32.totalorder %s4969_s11, %s4965_s10 }
  0x2a   : > { %p55_p4 = scmp.eq.s32.totalorder %s4973_s12, 0  ;;  %p4797_p6 = scmp.lt.s32.totalorder %s4973_s12, 2 }
  0x2b   : > { %s5092_s8 = scalar_select %p45_p2, %s4969_s11, %s47_s22  }
  0x2c   : > { %p56_p8 = por %p55_p4, %p54_p1  ;;  %p5506_p10 = scmp.eq.s32.totalorder %s5026_s13, 1 }
  0x2d   : > { %s123_s18 = sand.u32 1, %s4969_s11   ;;  %s4061_s24 = sshll.u32 %s4973_s12, 7 }
  0x2e   : > { %p5096_p12 = por %p5506_p10, %p54_p1  ;;  %s4060_s25 = sshll.u32 %s123_s18, 3 }
  0x2f   : > { %s5105_s27 = scalar_lea.hbm %s5497_s1, %s4061_s24  ;;  %s127_s19 = scalar_lea.vmem [#allocation5], %s4060_s25 }
  0x30   : > { %s134_s22 = sshll.u32 %s127_s19, 4  ;;  %p5107_p11 = pnand %p4797_p6, %p56_p8  ;;  %s5111_s22 = int_to_ptr.vmem [resolvable:$true] %s134_s22 }
  0x31   : > { %s124_s28 = scalar_lea.sflag [#allocation6], %s123_s18  ;;  %s4873_s29 = scalar_lea.hbm %s5105_s27, 128 }
  0x32   : > { %p4874_p13 = scmp.ne.s32.totalorder %s5105_s27, %s4873_s29  ;;  %p4875_p0 = pneg %p5107_p11 }
  0x33   : > { %s4878_s4 = scalar_lea.hbm %s5497_s1, 256  ;;  %p4879_p7 = scmp.lt.u32.totalorder %s5105_s27, %s5497_s1 }
  0x34   : > { %p4876_p3 = pnand %p4875_p0, %p4874_p13  ;;  %p4880_p9 = scmp.lt.u32.totalorder %s4878_s4, %s4873_s29 }
  0x35   : > { %p4882_p1 = scmp.lt.u32.totalorder %s4873_s29, %s5105_s27 }
  0x36   : > { %p4877_p5 = pneg %p4876_p3  ;;  %p4881_p2 = por %p4880_p9, %p4879_p7 }
  0x38   : > { %p4883_p4 = por %p4882_p1, %p4881_p2 }
  0x3a   : > { %p4884_p6 = pnand %p4883_p4, %p4877_p5 }
  0x3c   : > { %4887 = shalt.err (!%p4884_p6)
}
  0x3d   : > { %s4888_s7 = scalar_lea.vmem %s5111_s22, 128  ;;  %s4978_s18 = smov [#allocation5]  }
  0x3e   : > { %p4889_p8 = scmp.ne.s32.totalorder %s5111_s22, %s4888_s7  ;;  %s4893_s24 = sshll.u32 %s4978_s18, 4  ;;  %s4894_s24 = int_to_ptr.vmem [resolvable:$false] %s4893_s24 }
  0x3f   : > { %s4895_s25 = scalar_lea.vmem %s4894_s24, 256  ;;  %p4896_p3 = scmp.lt.s32.totalorder %s5111_s22, %s4894_s24 }
  0x40   : > { %p4891_p10 = pnand %p4889_p8, %p4875_p0  ;;  %p4897_p7 = scmp.lt.s32.totalorder %s4895_s25, %s4888_s7 }
  0x42   : > { %p4892_p13 = pneg %p4891_p10  ;;  %p4898_p9 = por %p4897_p7, %p4896_p3 }
  0x44   : > { %p4899_p2 = pnand %p4898_p9, %p4892_p13 }
  0x46   : > { %4902 = shalt.err (!%p4899_p2)
}
  0x47   : > { %4791 = dma.hbm_to_vmem [thread:$0]  (!%p5107_p11), %s5105_s27, 128, %s5111_s22, %s124_s28  }
  0x48   : > { %p5509_p5 = scmp.ne.s32.totalorder %s5504_s17, 0 }
  0x49   : > { %p5510_p0 = scmp.eq.s32.totalorder (!%p5509_p5), %s5026_s13, 0 }
  0x4a   : > { %143 = sbr.rel (%p5509_p5) target bundleno = 732 (0x2dc), region = 28 }
  0x51   : > { %4948 = dma.done.wait (%p5510_p0), [#allocation3], 256   ;;  %p5511_p1 = pmov %p5510_p0 }
  0x52   : > { %s5145_s20 = sand.u32 1, %s4965_s10   ;;  %p5512_p4 = scmp.ne.s32.totalorder %s5502_s15, 0 }
  0x53   : > { %4950 = vsyncadd (%p5511_p1), [#allocation3], 4294967040  ;;  %s4064_s26 = sshll.u32 %s5145_s20, 3  ;;  %s150_s19 = scalar_lea.sflag [#allocation6], %s5145_s20 }
  0x54   : > { %s153_s23 = scalar_lea.vmem [#allocation5], %s4064_s26 }
  0x55   : > { %4952 = dma.done.wait (%p5512_p4), %s150_s19, 128  }
  0x56   : > { %4954 = vsyncadd (%p5512_p4), %s150_s19, 4294967168  ;;  %v4979_v0 = vmov 0.0|0.0   ;;  %vm4980_vm0 = vmmov 0   ;;  %v4981_v1 = vmov 0.0   ;;  %vm177_vm1 = vcmask 130048   ;;  %v648_v2 = vld [vmem:[%s153_s23] sm:$0xff] }
  0x57   : > { %4552 = vmatprep.subr.bf16.mxu0 %v4979_v0  ;;  %4220 = vmatprep.mubr.msk.f32.mxu0 %vm4980_vm0, %v4981_v1  ;;  %v174_v3 = vld [vmem:[#allocation2] sm:$0xff]  ;;  %v175_v4 = vld [vmem:[#allocation2 + $0x8] sm:$0xff]  ;;  %s4982_s17 = smov 112   ;;  %s4983_s15 = smov 80   ;;  %v179_v7 = vsel %vm177_vm1, %v648_v2, 0  ;;  %vm640_vm2 = vcmask 261120  }
  0x58   : > { %4570 = vmatprep.subr.bf16.mxu1 %v4979_v0  ;;  %4262 = vmatprep.mubr.msk.f32.mxu1 %vm4980_vm0, %v4981_v1  ;;  %v182_v5 = vand.u32 4294901760, %v174_v3  ;;  %v185_v6 = vand.u32 4294901760, %v175_v4  ;;  %v248_v8 = vand.u32 4294901760, %v179_v7  ;;  %s4984_s27 = smov 96   ;;  %s4985_s22 = smov 64   ;;  %vm646_vm3 = vcmask 523520  }
  0x59   : > { %650 = vrot.lane.b32.xlu0 %v648_v2, %s4982_s17  ;;  %1597 = vrot.lane.b32.xlu1 %v648_v2, %s4983_s15  ;;  %s4986_s28 = smov 48   ;;  %s4987_s29 = smov 32   ;;  %vm1117_vm4 = vcmask 785920   ;;  %vm1122_vm5 = vcmask 1048320  }
  0x5a   : > { %v5160_v9 = vpack.c.bf16 %v185_v6, %v182_v5  ;;  %v260_v10 = vsub.f32 %v174_v3, %v182_v5  ;;  %v267_v11 = vsub.f32 %v175_v4, %v185_v6  ;;  %v249_v12 = vsub.f32 %v179_v7, %v248_v8  ;;  %s4988_s30 = smov 16   ;;  %s4065_s3 = sshll.u32 %s5145_s20, 5 }
  0x5b   : > { %s5386_s4 = scalar_lea.vmem [#allocation7], %s4065_s3  ;;  %s4071_s5 = sshll.u32 %s5026_s13, 9 }
  0x5c   : > { %v261_v13 = vand.u32 4294901760, %v260_v10  ;;  %v268_v14 = vand.u32 4294901760, %v267_v11  ;;  %4554 = vmatpush3.bf16.msra.mxu0 %v5160_v9  ;;  %v250_v15 = vand.u32 4294901760, %v249_v12  ;;  %4572 = vmatpush3.bf16.msra.mxu1 %v5160_v9  ;;  %v5175_v23 = vpack.c.bf16 %v267_v11, %v260_v10  ;;  %s3974_s6 = sshll.u32 %s5386_s4, 4  ;;  %s5450_s24 = scalar_lea.hbm %s5498_s2, %s4071_s5  ;;  %s5452_s6 = int_to_ptr.vmem [resolvable:$true] %s3974_s6 }
  0x5d   : > { %1126 = vrot.lane.b32.xlu0 %v648_v2, %s4984_s27  ;;  %2071 = vrot.lane.b32.xlu1 %v648_v2, %s4985_s22  ;;  %s3960_s25 = scalar_lea.sflag [#allocation4], %s5145_s20  ;;  %s4903_s26 = scalar_lea.vmem %s5452_s6, 512 }
  0x5e   : > { %4555 = vmatprep.subr.bf16.mxu0 %v4979_v0  ;;  %v262_v16 = vsub.f32 %v260_v10, %v261_v13  ;;  %v269_v17 = vsub.f32 %v267_v11, %v268_v14  ;;  %4573 = vmatprep.subr.bf16.mxu1 %v4979_v0  ;;  %v251_v18 = vsub.f32 %v249_v12, %v250_v15  ;;  %p4904_p11 = scmp.ne.s32.totalorder %s5452_s6, %s4903_s26  ;;  %s4989_s13 = smov [#allocation7]  }
  0x5f   : > { %v5185_v24 = vpack.c.bf16 %v268_v14, %v261_v13  ;;  %s4907_s19 = sshll.u32 %s4989_s13, 4  ;;  %s4908_s19 = int_to_ptr.vmem [resolvable:$false] %s4907_s19 }
  0x60   : > { %v263_v19 = vand.u32 4294901760, %v262_v16  ;;  %v270_v20 = vand.u32 4294901760, %v269_v17  ;;  %v252_v21 = vand.u32 4294901760, %v251_v18  ;;  %p4905_p6 = pnand %p4904_p11, %p5096_p12  ;;  %s4909_s23 = scalar_lea.vmem %s4908_s19, 1024 }
  0x61   : > { %2542 = vrot.lane.b32.xlu0 %v648_v2, %s4986_s28  ;;  %3016 = vrot.lane.b32.xlu1 %v648_v2, %s4987_s29  ;;  %p4910_p10 = scmp.lt.s32.totalorder %s5452_s6, %s4908_s19  ;;  %p4911_p13 = scmp.lt.s32.totalorder %s4909_s23, %s4903_s26 }
  0x62   : > { %v5169_v22 = vpack.c.bf16 %v270_v20, %v263_v19  ;;  %4221 = vmatmul.mubr.f32.vlgmr.msra.gmra.mrb[0].mxu0 %v252_v21  ;;  %p4906_p8 = pneg %p4905_p6 }
  0x63   : > { %4227 = vmatprep.mubr.msk.f32.mxu0 %vm4980_vm0, %v4981_v1  ;;  %p4912_p3 = por %p4911_p13, %p4910_p10 }
  0x64   : > { %4557 = vmatpush3.bf16.msra.mxu0 %v5169_v22 }
  0x65   : > { %4558 = vmatprep.subr.bf16.mxu0 %v4979_v0  ;;  %3487 = vrot.lane.b32.xlu0 %v648_v2, %s4988_s30  ;;  %p4913_p7 = pnand %p4912_p3, %p4906_p8 }
  0x6a   : > { %4228 = vmatmul.mubr.f32.vlgmr.msra.gmra.mrb[0].mxu0 %v248_v8 }
  0x6b   : > { %4560 = vmatpush3.bf16.msra.mxu0 %v5175_v23  ;;  %4234 = vmatprep.mubr.msk.f32.mxu0 %vm4980_vm0, %v4981_v1 }
  0x6c   : > { %4561 = vmatprep.subr.bf16.mxu0 %v4979_v0 }
  0x72   : > { %4235 = vmatmul.mubr.f32.vlgmr.msra.gmra.mrb[0].mxu0 %v249_v12 }
  0x73   : > { %4563 = vmatpush3.bf16.msra.mxu0 %v5160_v9  ;;  %4241 = vmatprep.mubr.msk.f32.mxu0 %vm4980_vm0, %v4981_v1 }
  0x74   : > { %4564 = vmatprep.subr.bf16.mxu0 %v4979_v0 }
  0x7a   : > { %4242 = vmatmul.mubr.f32.vlgmr.msra.gmra.mrb[0].mxu0 %v250_v15 }
  0x7b   : > { %4566 = vmatpush3.bf16.msra.mxu0 %v5185_v24  ;;  %4248 = vmatprep.mubr.msk.f32.mxu0 %vm4980_vm0, %v4981_v1 }
  0x7c   : > { %4567 = vmatprep.subr.bf16.mxu0 %v4979_v0 }
  0x82   : > { %4249 = vmatmul.mubr.f32.vlgmr.msra.gmra.mrb[0].mxu0 %v248_v8 }
  0x83   : > { %4569 = vmatpush3.bf16.msra.mxu0 %v5160_v9  ;;  %4255 = vmatprep.mubr.msk.f32.mxu0 %vm4980_vm0, %v4981_v1 }
  0x84   : > { %4588 = vmatprep.subr.bf16.mxu0 %v4979_v0 }
  0x8a   : > { %4256 = vmatmul.mubr.f32.vlgmr.msra.gmra.mrb[0].mxu0 %v248_v8 }
  0x8b   : > { %4590 = vmatpush3.bf16.msra.mxu0 %v5160_v9  ;;  %4304 = vmatprep.mubr.msk.f32.mxu0 %vm4980_vm0, %v4981_v1 }
  0x8c   : > { %4591 = vmatprep.subr.bf16.mxu0 %v4979_v0 }
  0xcb   : > { %v651_v25 = vpop.permute.xlu0 %650  ;;  %v1598_v39 = vpop.permute.xlu1 %1597 }
  0xcc   : > { %v652_v26 = vsel %vm177_vm1, %v651_v25, 0  ;;  %v1599_v41 = vsel %vm177_vm1, %v1598_v39, 0 }
  0xcd   : > { %v5200_v27 = vand.u32 4294901760, %v652_v26  ;;  %v5238_v43 = vand.u32 4294901760, %v1599_v41 }
  0xcf   : > { %v722_v28 = vsub.f32 %v652_v26, %v5200_v27  ;;  %v1127_v29 = vpop.permute.xlu0 %1126  ;;  %v2072_v40 = vpop.permute.xlu1 %2071  ;;  %v1669_v45 = vsub.f32 %v1599_v41, %v5238_v43 }
  0xd0   : > { %v1128_v30 = vsel %vm177_vm1, %v1127_v29, 0  ;;  %v2073_v42 = vsel %vm177_vm1, %v2072_v40, 0 }
  0xd1   : > { %v723_v31 = vand.u32 4294901760, %v722_v28  ;;  %v5204_v32 = vand.u32 4294901760, %v1128_v30  ;;  %v5241_v44 = vand.u32 4294901760, %v2073_v42  ;;  %v1670_v47 = vand.u32 4294901760, %v1669_v45 }
  0xd3   : > { %v1198_v33 = vsub.f32 %v1128_v30, %v5204_v32  ;;  %v724_v34 = vsub.f32 %v722_v28, %v723_v31  ;;  %v2143_v46 = vsub.f32 %v2073_v42, %v5241_v44  ;;  %v1671_v49 = vsub.f32 %v1669_v45, %v1670_v47  ;;  %v2543_v53 = vpop.permute.xlu0 %2542  ;;  %v3017_v54 = vpop.permute.xlu1 %3016 }
  0xd4   : > { %v2544_v55 = vsel %vm177_vm1, %v2543_v53, 0  ;;  %v3018_v56 = vsel %vm177_vm1, %v3017_v54, 0 }
  0xd5   : > { %v1199_v35 = vand.u32 4294901760, %v1198_v33  ;;  %v725_v36 = vand.u32 4294901760, %v724_v34  ;;  %v2144_v48 = vand.u32 4294901760, %v2143_v46  ;;  %v1672_v51 = vand.u32 4294901760, %v1671_v49 }
  0xd6   : > { %v5300_v57 = vand.u32 4294901760, %v2544_v55  ;;  %v5303_v58 = vand.u32 4294901760, %v3018_v56 }
  0xd7   : > { %v1200_v37 = vsub.f32 %v1198_v33, %v1199_v35  ;;  %4263 = vmatmul.mubr.f32.vlgmr.msra.gmra.mrb[0].mxu1 %v725_v36  ;;  %v2145_v50 = vsub.f32 %v2143_v46, %v2144_v48  ;;  %v3488_v5 = vpop.permute.xlu0 %3487 }
  0xd8   : > { %4575 = vmatpush3.bf16.msra.mxu1 %v5169_v22  ;;  %4269 = vmatprep.mubr.msk.f32.mxu1 %vm4980_vm0, %v4981_v1  ;;  %v2614_v59 = vsub.f32 %v2544_v55, %v5300_v57  ;;  %v3088_v60 = vsub.f32 %v3018_v56, %v5303_v58  ;;  %v3489_v6 = vsel %vm177_vm1, %v3488_v5, 0 }
  0xd9   : > { %v1201_v38 = vand.u32 4294901760, %v1200_v37  ;;  %4576 = vmatprep.subr.bf16.mxu1 %v4979_v0  ;;  %v2146_v52 = vand.u32 4294901760, %v2145_v50  ;;  %v3558_v7 = vand.u32 4294901760, %v3489_v6 }
  0xda   : > { %v2615_v61 = vand.u32 4294901760, %v2614_v59  ;;  %v3089_v62 = vand.u32 4294901760, %v3088_v60 }
  0xdb   : > { %4305 = vmatmul.mubr.f32.vlgmr.msra.gmra.mrb[2].mxu0 %v1201_v38  ;;  %v3559_v8 = vsub.f32 %v3489_v6, %v3558_v7 }
  0xdc   : > { %4593 = vmatpush3.bf16.msra.mxu0 %v5169_v22  ;;  %4311 = vmatprep.mubr.msk.f32.mxu0 %vm4980_vm0, %v4981_v1  ;;  %v2616_v63 = vsub.f32 %v2614_v59, %v2615_v61  ;;  %v3090_v2 = vsub.f32 %v3088_v60, %v3089_v62 }
  0xdd   : > { %4594 = vmatprep.subr.bf16.mxu0 %v4979_v0  ;;  %v3560_v10 = vand.u32 4294901760, %v3559_v8 }
  0xde   : > { %v2617_v3 = vand.u32 4294901760, %v2616_v63  ;;  %v3091_v4 = vand.u32 4294901760, %v3090_v2 }
  0xdf   : > { %4270 = vmatmul.mubr.f32.vlgmr.msra.gmra.mrb[0].mxu1 %v5200_v27  ;;  %v3561_v11 = vsub.f32 %v3559_v8, %v3560_v10 }
  0xe0   : > { %4578 = vmatpush3.bf16.msra.mxu1 %v5175_v23  ;;  %4276 = vmatprep.mubr.msk.f32.mxu1 %vm4980_vm0, %v4981_v1 }
  0xe1   : > { %4579 = vmatprep.subr.bf16.mxu1 %v4979_v0  ;;  %v3562_v12 = vand.u32 4294901760, %v3561_v11 }
  0xe3   : > { %4312 = vmatmul.mubr.f32.vlgmr.msra.gmra.mrb[2].mxu0 %v5204_v32 }
  0xe4   : > { %4596 = vmatpush3.bf16.msra.mxu0 %v5175_v23  ;;  %4318 = vmatprep.mubr.msk.f32.mxu0 %vm4980_vm0, %v4981_v1 }
  0xe5   : > { %4597 = vmatprep.subr.bf16.mxu0 %v4979_v0 }
  0xe7   : > { %4277 = vmatmul.mubr.f32.vlgmr.msra.gmra.mrb[0].mxu1 %v722_v28 }
  0xe8   : > { %4581 = vmatpush3.bf16.msra.mxu1 %v5160_v9  ;;  %4283 = vmatprep.mubr.msk.f32.mxu1 %vm4980_vm0, %v4981_v1 }
  0xe9   : > { %4582 = vmatprep.subr.bf16.mxu1 %v4979_v0 }
  0xeb   : > { %4319 = vmatmul.mubr.f32.vlgmr.msra.gmra.mrb[2].mxu0 %v1198_v33 }
  0xec   : > { %4599 = vmatpush3.bf16.msra.mxu0 %v5160_v9  ;;  %4325 = vmatprep.mubr.msk.f32.mxu0 %vm4980_vm0, %v4981_v1 }
  0xed   : > { %4600 = vmatprep.subr.bf16.mxu0 %v4979_v0 }
  0xef   : > { %4284 = vmatmul.mubr.f32.vlgmr.msra.gmra.mrb[0].mxu1 %v723_v31 }
  0xf0   : > { %4584 = vmatpush3.bf16.msra.mxu1 %v5185_v24  ;;  %4290 = vmatprep.mubr.msk.f32.mxu1 %vm4980_vm0, %v4981_v1 }
  0xf1   : > { %4585 = vmatprep.subr.bf16.mxu1 %v4979_v0 }
  0xf3   : > { %4326 = vmatmul.mubr.f32.vlgmr.msra.gmra.mrb[2].mxu0 %v1199_v35 }
  0xf4   : > { %4602 = vmatpush3.bf16.msra.mxu0 %v5185_v24  ;;  %4332 = vmatprep.mubr.msk.f32.mxu0 %vm4980_vm0, %v4981_v1 }
  0xf5   : > { %4603 = vmatprep.subr.bf16.mxu0 %v4979_v0 }
  0xf7   : > { %4291 = vmatmul.mubr.f32.vlgmr.msra.gmra.mrb[0].mxu1 %v5200_v27 }
  0xf8   : > { %4587 = vmatpush3.bf16.msra.mxu1 %v5160_v9  ;;  %4297 = vmatprep.mubr.msk.f32.mxu1 %vm4980_vm0, %v4981_v1 }
  0xf9   : > { %4606 = vmatprep.subr.bf16.mxu1 %v4979_v0 }
  0xfb   : > { %4333 = vmatmul.mubr.f32.vlgmr.msra.gmra.mrb[2].mxu0 %v5204_v32 }
  0xfc   : > { %4605 = vmatpush3.bf16.msra.mxu0 %v5160_v9  ;;  %4339 = vmatprep.mubr.msk.f32.mxu0 %vm4980_vm0, %v4981_v1 }
  0xfd   : > { %4624 = vmatprep.subr.bf16.mxu0 %v4979_v0 }
  0xff   : > { %4298 = vmatmul.mubr.f32.vlgmr.msra.gmra.mrb[0].mxu1 %v5200_v27 }
 0x100   : > { %4608 = vmatpush3.bf16.msra.mxu1 %v5160_v9  ;;  %4346 = vmatprep.mubr.msk.f32.mxu1 %vm4980_vm0, %v4981_v1 }
 0x101   : > { %4609 = vmatprep.subr.bf16.mxu1 %v4979_v0 }
 0x103   : > { %4340 = vmatmul.mubr.f32.vlgmr.msra.gmra.mrb[2].mxu0 %v5204_v32  ;;  %4347 = vmatmul.mubr.f32.vlgmr.msra.gmra.mrb[2].mxu1 %v1672_v51 }
 0x104   : > { %4611 = vmatpush3.bf16.msra.mxu1 %v5169_v22  ;;  %4626 = vmatpush3.bf16.msra.mxu0 %v5160_v9 }
 0x105   : > { %4388 = vmatprep.mubr.msk.f32.mxu0 %vm4980_vm0, %v4981_v1  ;;  %4353 = vmatprep.mubr.msk.f32.mxu1 %vm4980_vm0, %v4981_v1 }
 0x106   : > { %4612 = vmatprep.subr.bf16.mxu1 %v4979_v0  ;;  %4627 = vmatprep.subr.bf16.mxu0 %v4979_v0 }
 0x107   : > { %4389 = vmatmul.mubr.f32.vlgmr.msra.gmra.mrb[4].mxu0 %v2146_v52 }
 0x108   : > { %4629 = vmatpush3.bf16.msra.mxu0 %v5169_v22  ;;  %4395 = vmatprep.mubr.msk.f32.mxu0 %vm4980_vm0, %v4981_v1 }
 0x109   : > { %4630 = vmatprep.subr.bf16.mxu0 %v4979_v0 }
 0x10b   : > { %4354 = vmatmul.mubr.f32.vlgmr.msra.gmra.mrb[2].mxu1 %v5238_v43 }
 0x10c   : > { %4614 = vmatpush3.bf16.msra.mxu1 %v5175_v23  ;;  %4360 = vmatprep.mubr.msk.f32.mxu1 %vm4980_vm0, %v4981_v1 }
 0x10d   : > { %4615 = vmatprep.subr.bf16.mxu1 %v4979_v0 }
 0x10f   : > { %4396 = vmatmul.mubr.f32.vlgmr.msra.gmra.mrb[4].mxu0 %v5241_v44 }
 0x110   : > { %4632 = vmatpush3.bf16.msra.mxu0 %v5175_v23  ;;  %4402 = vmatprep.mubr.msk.f32.mxu0 %vm4980_vm0, %v4981_v1 }
 0x111   : > { %4633 = vmatprep.subr.bf16.mxu0 %v4979_v0 }
 0x113   : > { %4361 = vmatmul.mubr.f32.vlgmr.msra.gmra.mrb[2].mxu1 %v1669_v45 }
 0x114   : > { %4617 = vmatpush3.bf16.msra.mxu1 %v5160_v9  ;;  %4367 = vmatprep.mubr.msk.f32.mxu1 %vm4980_vm0, %v4981_v1 }
 0x115   : > { %4618 = vmatprep.subr.bf16.mxu1 %v4979_v0 }
 0x117   : > { %4403 = vmatmul.mubr.f32.vlgmr.msra.gmra.mrb[4].mxu0 %v2143_v46 }
 0x118   : > { %4635 = vmatpush3.bf16.msra.mxu0 %v5160_v9  ;;  %4409 = vmatprep.mubr.msk.f32.mxu0 %vm4980_vm0, %v4981_v1 }
 0x119   : > { %4636 = vmatprep.subr.bf16.mxu0 %v4979_v0 }
 0x11b   : > { %4368 = vmatmul.mubr.f32.vlgmr.msra.gmra.mrb[2].mxu1 %v1670_v47 }
 0x11c   : > { %4620 = vmatpush3.bf16.msra.mxu1 %v5185_v24  ;;  %4374 = vmatprep.mubr.msk.f32.mxu1 %vm4980_vm0, %v4981_v1 }
 0x11d   : > { %4621 = vmatprep.subr.bf16.mxu1 %v4979_v0 }
 0x11f   : > { %4410 = vmatmul.mubr.f32.vlgmr.msra.gmra.mrb[4].mxu0 %v2144_v48 }
 0x120   : > { %4638 = vmatpush3.bf16.msra.mxu0 %v5185_v24  ;;  %4416 = vmatprep.mubr.msk.f32.mxu0 %vm4980_vm0, %v4981_v1 }
 0x121   : > { %4639 = vmatprep.subr.bf16.mxu0 %v4979_v0 }
 0x123   : > { %4375 = vmatmul.mubr.f32.vlgmr.msra.gmra.mrb[2].mxu1 %v5238_v43 }
 0x124   : > { %4623 = vmatpush3.bf16.msra.mxu1 %v5160_v9  ;;  %4381 = vmatprep.mubr.msk.f32.mxu1 %vm4980_vm0, %v4981_v1 }
 0x125   : > { %4642 = vmatprep.subr.bf16.mxu1 %v4979_v0 }
 0x127   : > { %4417 = vmatmul.mubr.f32.vlgmr.msra.gmra.mrb[4].mxu0 %v5241_v44 }
 0x128   : > { %4641 = vmatpush3.bf16.msra.mxu0 %v5160_v9  ;;  %4423 = vmatprep.mubr.msk.f32.mxu0 %vm4980_vm0, %v4981_v1 }
 0x129   : > { %4660 = vmatprep.subr.bf16.mxu0 %v4979_v0 }
 0x12b   : > { %4382 = vmatmul.mubr.f32.vlgmr.msra.gmra.mrb[2].mxu1 %v5238_v43 }
 0x12c   : > { %4644 = vmatpush3.bf16.msra.mxu1 %v5160_v9  ;;  %4430 = vmatprep.mubr.msk.f32.mxu1 %vm4980_vm0, %v4981_v1 }
 0x12d   : > { %4645 = vmatprep.subr.bf16.mxu1 %v4979_v0 }
 0x12f   : > { %4424 = vmatmul.mubr.f32.vlgmr.msra.gmra.mrb[4].mxu0 %v5241_v44  ;;  %4431 = vmatmul.mubr.f32.vlgmr.msra.gmra.mrb[4].mxu1 %v2617_v3 }
 0x130   : > { %4647 = vmatpush3.bf16.msra.mxu1 %v5169_v22  ;;  %4662 = vmatpush3.bf16.msra.mxu0 %v5160_v9 }
 0x131   : > { %4472 = vmatprep.mubr.msk.f32.mxu0 %vm4980_vm0, %v4981_v1  ;;  %4437 = vmatprep.mubr.msk.f32.mxu1 %vm4980_vm0, %v4981_v1 }
 0x132   : > { %4648 = vmatprep.subr.bf16.mxu1 %v4979_v0  ;;  %4663 = vmatprep.subr.bf16.mxu0 %v4979_v0 }
 0x133   : > { %4473 = vmatmul.mubr.f32.vlgmr.msra.gmra.mrb[6].mxu0 %v3091_v4 }
 0x134   : > { %4665 = vmatpush3.bf16.msra.mxu0 %v5169_v22  ;;  %4479 = vmatprep.mubr.msk.f32.mxu0 %vm4980_vm0, %v4981_v1 }
 0x135   : > { %4666 = vmatprep.subr.bf16.mxu0 %v4979_v0 }
 0x137   : > { %4438 = vmatmul.mubr.f32.vlgmr.msra.gmra.mrb[4].mxu1 %v5300_v57 }
 0x138   : > { %4650 = vmatpush3.bf16.msra.mxu1 %v5175_v23  ;;  %4444 = vmatprep.mubr.msk.f32.mxu1 %vm4980_vm0, %v4981_v1 }
 0x139   : > { %4651 = vmatprep.subr.bf16.mxu1 %v4979_v0 }
 0x13b   : > { %4480 = vmatmul.mubr.f32.vlgmr.msra.gmra.mrb[6].mxu0 %v5303_v58 }
 0x13c   : > { %4668 = vmatpush3.bf16.msra.mxu0 %v5175_v23  ;;  %4486 = vmatprep.mubr.msk.f32.mxu0 %vm4980_vm0, %v4981_v1 }
 0x13d   : > { %4669 = vmatprep.subr.bf16.mxu0 %v4979_v0 }
 0x13f   : > { %4445 = vmatmul.mubr.f32.vlgmr.msra.gmra.mrb[4].mxu1 %v2614_v59 }
 0x140   : > { %4653 = vmatpush3.bf16.msra.mxu1 %v5160_v9  ;;  %4451 = vmatprep.mubr.msk.f32.mxu1 %vm4980_vm0, %v4981_v1 }
 0x141   : > { %4654 = vmatprep.subr.bf16.mxu1 %v4979_v0 }
 0x143   : > { %4487 = vmatmul.mubr.f32.vlgmr.msra.gmra.mrb[6].mxu0 %v3088_v60 }
 0x144   : > { %4671 = vmatpush3.bf16.msra.mxu0 %v5160_v9  ;;  %4493 = vmatprep.mubr.msk.f32.mxu0 %vm4980_vm0, %v4981_v1 }
 0x145   : > { %4672 = vmatprep.subr.bf16.mxu0 %v4979_v0 }
 0x147   : > { %4452 = vmatmul.mubr.f32.vlgmr.msra.gmra.mrb[4].mxu1 %v2615_v61 }
 0x148   : > { %4656 = vmatpush3.bf16.msra.mxu1 %v5185_v24  ;;  %4458 = vmatprep.mubr.msk.f32.mxu1 %vm4980_vm0, %v4981_v1 }
 0x149   : > { %4657 = vmatprep.subr.bf16.mxu1 %v4979_v0 }
 0x14b   : > { %4494 = vmatmul.mubr.f32.vlgmr.msra.gmra.mrb[6].mxu0 %v3089_v62 }
 0x14c   : > { %4674 = vmatpush3.bf16.msra.mxu0 %v5185_v24  ;;  %4500 = vmatprep.mubr.msk.f32.mxu0 %vm4980_vm0, %v4981_v1 }
 0x14d   : > { %4675 = vmatprep.subr.bf16.mxu0 %v4979_v0 }
 0x14f   : > { %4459 = vmatmul.mubr.f32.vlgmr.msra.gmra.mrb[4].mxu1 %v5300_v57 }
 0x150   : > { %4659 = vmatpush3.bf16.msra.mxu1 %v5160_v9  ;;  %4465 = vmatprep.mubr.msk.f32.mxu1 %vm4980_vm0, %v4981_v1 }
 0x151   : > { %4678 = vmatprep.subr.bf16.mxu1 %v4979_v0 }
 0x153   : > { %4501 = vmatmul.mubr.f32.vlgmr.msra.gmra.mrb[6].mxu0 %v5303_v58 }
 0x154   : > { %4677 = vmatpush3.bf16.msra.mxu0 %v5160_v9  ;;  %4507 = vmatprep.mubr.msk.f32.mxu0 %vm4980_vm0, %v4981_v1 }
 0x157   : > { %4466 = vmatmul.mubr.f32.vlgmr.msra.gmra.mrb[4].mxu1 %v5300_v57 }
 0x158   : > { %4680 = vmatpush3.bf16.msra.mxu1 %v5160_v9  ;;  %4514 = vmatprep.mubr.msk.f32.mxu1 %vm4980_vm0, %v4981_v1 }
 0x159   : > { %4681 = vmatprep.subr.bf16.mxu1 %v4979_v0 }
 0x15b   : > { %4508 = vmatmul.mubr.f32.vlgmr.msra.gmra.mrb[6].mxu0 %v5303_v58  ;;  %4515 = vmatmul.mubr.f32.vlgmr.msra.gmra.mrb[6].mxu1 %v3562_v12 }
 0x15c   : > { %4683 = vmatpush3.bf16.msra.mxu1 %v5169_v22  ;;  %4521 = vmatprep.mubr.msk.f32.mxu1 %vm4980_vm0, %v4981_v1 }
 0x15d   : > { %4684 = vmatprep.subr.bf16.mxu1 %v4979_v0  ;;  %v636_v13 = vpop.f32.mrb[0].mxu0 }
 0x15e   : > { %641 = vst.msk [vmem:[%s5386_s4] sm:$0xff] %vm640_vm2, %v636_v13  ;;  %v4257_v14 = vpop.f32.mrb[1].mxu0  ;;  %643 = vrot.lane.b32.xlu1 %v636_v13, %s4987_s29 }
 0x163   : > { %4522 = vmatmul.mubr.f32.vlgmr.msra.gmra.mrb[6].mxu1 %v3558_v7 }
 0x164   : > { %4686 = vmatpush3.bf16.msra.mxu1 %v5175_v23  ;;  %4528 = vmatprep.mubr.msk.f32.mxu1 %vm4980_vm0, %v4981_v1 }
 0x165   : > { %4687 = vmatprep.subr.bf16.mxu1 %v4979_v0 }
 0x16b   : > { %4529 = vmatmul.mubr.f32.vlgmr.msra.gmra.mrb[6].mxu1 %v3559_v8 }
 0x16c   : > { %4689 = vmatpush3.bf16.msra.mxu1 %v5160_v9  ;;  %4535 = vmatprep.mubr.msk.f32.mxu1 %vm4980_vm0, %v4981_v1 }
 0x16d   : > { %4690 = vmatprep.subr.bf16.mxu1 %v4979_v0 }
 0x173   : > { %4536 = vmatmul.mubr.f32.vlgmr.msra.gmra.mrb[6].mxu1 %v3560_v10 }
 0x174   : > { %4692 = vmatpush3.bf16.msra.mxu1 %v5185_v24  ;;  %4542 = vmatprep.mubr.msk.f32.mxu1 %vm4980_vm0, %v4981_v1 }
 0x175   : > { %4693 = vmatprep.subr.bf16.mxu1 %v4979_v0 }
 0x17b   : > { %4543 = vmatmul.mubr.f32.vlgmr.msra.gmra.mrb[6].mxu1 %v3558_v7 }
 0x17c   : > { %4695 = vmatpush3.bf16.msra.mxu1 %v5160_v9  ;;  %4549 = vmatprep.mubr.msk.f32.mxu1 %vm4980_vm0, %v4981_v1 }
 0x183   : > { %4550 = vmatmul.mubr.f32.vlgmr.msra.gmra.mrb[6].mxu1 %v3558_v7 }
 0x1d0   : > { %v644_v16 = vpop.permute.xlu1 %643 }
 0x1d1   : > { %647 = vst.msk [vmem:[%s5386_s4] sm:$0xff] %vm646_vm3, %v644_v16 }
 0x1d2   : > { %v1109_v15 = vpop.f32.mrb[0].mxu1 }
 0x1d3   : > { %v4299_v17 = vpop.f32.mrb[1].mxu1  ;;  %1114 = vrot.lane.b32.xlu1 %v1109_v15, %s4985_s22 }
 0x1d6   : > { %v1585_v18 = vpop.f32.mrb[2].mxu0 }
 0x1d7   : > { %1589 = vst.msk [vmem:[%s5386_s4 + $0x8] sm:$0xff] %vm640_vm2, %v1585_v18  ;;  %1119 = vrot.lane.b32.xlu1 %v1109_v15, %s4984_s27  ;;  %1591 = vrot.lane.b32.xlu0 %v1585_v18, %s4987_s29  ;;  %v4341_v0 = vpop.f32.mrb[3].mxu0 }
 0x1fe   : > { %v2056_v1 = vpop.f32.mrb[2].mxu1 }
 0x1ff   : > { %v4383_v9 = vpop.f32.mrb[3].mxu1  ;;  %2061 = vrot.lane.b32.xlu0 %v2056_v1, %s4985_s22 }
 0x202   : > { %v2530_v19 = vpop.f32.mrb[4].mxu0 }
 0x203   : > { %2534 = vst.msk [vmem:[%s5386_s4 + $0x10] sm:$0xff] %vm640_vm2, %v2530_v19  ;;  %2065 = vrot.lane.b32.xlu0 %v2056_v1, %s4984_s27  ;;  %2536 = vrot.lane.b32.xlu1 %v2530_v19, %s4987_s29  ;;  %v4425_v20 = vpop.f32.mrb[5].mxu0 }
 0x22a   : > { %v3001_v21 = vpop.f32.mrb[4].mxu1 }
 0x22b   : > { %v4467_v22 = vpop.f32.mrb[5].mxu1  ;;  %3006 = vrot.lane.b32.xlu1 %v3001_v21, %s4985_s22 }
 0x22e   : > { %v3475_v23 = vpop.f32.mrb[6].mxu0 }
 0x22f   : > { %3479 = vst.msk [vmem:[%s5386_s4 + $0x18] sm:$0xff] %vm640_vm2, %v3475_v23  ;;  %3010 = vrot.lane.b32.xlu1 %v3001_v21, %s4984_s27  ;;  %3481 = vrot.lane.b32.xlu0 %v3475_v23, %s4987_s29  ;;  %v4509_v24 = vpop.f32.mrb[7].mxu0 }
 0x245   : > { %v1115_v25 = vpop.permute.xlu1 %1114 }
 0x246   : > { %1118 = vst.msk [vmem:[%s5386_s4] sm:$0xff] %vm1117_vm4, %v1115_v25 }
 0x249   : > { %v1120_v26 = vpop.permute.xlu1 %1119  ;;  %v1592_v27 = vpop.permute.xlu0 %1591 }
 0x24a   : > { %1123 = vst.msk [vmem:[%s5386_s4] sm:$0xff] %vm1122_vm5, %v1120_v26 }
 0x24b   : > { %1594 = vst.msk [vmem:[%s5386_s4 + $0x8] sm:$0xff] %vm646_vm3, %v1592_v27 }
 0x256   : > { %v3946_v28 = vpop.f32.mrb[6].mxu1 }
 0x257   : > { %v4551_v29 = vpop.f32.mrb[7].mxu1  ;;  %3951 = vrot.lane.b32.xlu0 %v3946_v28, %s4985_s22 }
 0x25b   : > { %3955 = vrot.lane.b32.xlu0 %v3946_v28, %s4984_s27 }
 0x271   : > { %v2062_v30 = vpop.permute.xlu0 %2061 }
 0x272   : > { %2064 = vst.msk [vmem:[%s5386_s4 + $0x8] sm:$0xff] %vm1117_vm4, %v2062_v30 }
 0x275   : > { %v2066_v31 = vpop.permute.xlu0 %2065  ;;  %v2537_v32 = vpop.permute.xlu1 %2536 }
 0x276   : > { %2068 = vst.msk [vmem:[%s5386_s4 + $0x8] sm:$0xff] %vm1122_vm5, %v2066_v31 }
 0x277   : > { %2539 = vst.msk [vmem:[%s5386_s4 + $0x10] sm:$0xff] %vm646_vm3, %v2537_v32 }
 0x29d   : > { %v3007_v33 = vpop.permute.xlu1 %3006 }
 0x29e   : > { %3009 = vst.msk [vmem:[%s5386_s4 + $0x10] sm:$0xff] %vm1117_vm4, %v3007_v33 }
 0x2a1   : > { %v3011_v34 = vpop.permute.xlu1 %3010  ;;  %v3482_v35 = vpop.permute.xlu0 %3481 }
 0x2a2   : > { %3013 = vst.msk [vmem:[%s5386_s4 + $0x10] sm:$0xff] %vm1122_vm5, %v3011_v34 }
 0x2a3   : > { %3484 = vst.msk [vmem:[%s5386_s4 + $0x18] sm:$0xff] %vm646_vm3, %v3482_v35 }
 0x2c9   : > { %v3952_v36 = vpop.permute.xlu0 %3951 }
 0x2ca   : > { %3954 = vst.msk [vmem:[%s5386_s4 + $0x18] sm:$0xff] %vm1117_vm4, %v3952_v36 }
 0x2cd   : > { %v3956_v37 = vpop.permute.xlu0 %3955 }
 0x2ce   : > { %3958 = vst.msk [vmem:[%s5386_s4 + $0x18] sm:$0xff] %vm1122_vm5, %v3956_v37 }
 0x2cf   : > { %4916 = shalt.err (!%p4913_p7)
}
 0x2d0   : > { %s4917_s20 = scalar_lea.hbm %s5450_s24, 512  ;;  %s4921_s27 = scalar_lea.hbm %s5498_s2, 1024 }
 0x2d1   : > { %p4918_p9 = scmp.ne.s32.totalorder %s5450_s24, %s4917_s20  ;;  %p4922_p0 = scmp.lt.u32.totalorder %s5450_s24, %s5498_s2 }
 0x2d2   : > { %p4923_p1 = scmp.lt.u32.totalorder %s4921_s27, %s4917_s20  ;;  %p4925_p11 = scmp.lt.u32.totalorder %s4917_s20, %s5450_s24 }
 0x2d3   : > { %p4919_p2 = pnand %p4918_p9, %p5096_p12 }
 0x2d4   : > { %p4924_p4 = por %p4923_p1, %p4922_p0 }
 0x2d5   : > { %p4920_p5 = pneg %p4919_p2 }
 0x2d6   : > { %p4926_p6 = por %p4925_p11, %p4924_p4 }
 0x2d8   : > { %p4927_p8 = pnand %p4926_p6, %p4920_p5 }
 0x2da   : > { %4930 = shalt.err (!%p4927_p8)
}
 0x2db   : > { %4782 = dma.vmem_to_hbm [thread:$0]  (%p5096_p12), %s5452_s6, 512, %s5450_s24, %s3960_s25  }
 0x2dc PF: > { %s3986_s29 = sand.u32 1, %s4961_s9   ;;  %p5513_p10 = scmp.ne.s32.totalorder %s5503_s16, 0 }
 0x2dd   : > { %p5514_p13 = scmp.ge.s32.totalorder %s4973_s12, 2  ;;  %s3987_s30 = scalar_lea.sflag [#allocation4], %s3986_s29 }
 0x2df   : > { %p4793_p3 = pnand %p5514_p13, %p5513_p10 }
 0x2e1   : > { %4956 = dma.done.wait (!%p4793_p3), %s3987_s30, 512  }
 0x2e2   : > { %4958 = vsyncadd (!%p4793_p3), %s3987_s30, 4294966784  ;;  %p16_p7 = scmp.ge.s32.totalorder %s5061_s21, 4   ;;  %s5515_s9 = smov %s4965_s10 }
 0x2e3   : > { %s5516_s10 = smov %s4969_s11  ;;  %s5517_s11 = smov %s5092_s8 }
 0x2e4   : > { %s5518_s12 = smov %s5061_s21  ;;  %18 = sbr.rel (!%p16_p7) target bundleno = 6 (0x6), region = 78 }
 0x2eb   :  { %3992 = vsyncpa [#allocation3], 1 }
 0x2ec   :  { %3994 = vsyncpa [#allocation3 + $0x1], 1 }
 0x2ed   :  { %3995 = vsyncpa [#allocation6], 1 }
 0x2ee   :  { %3997 = vsyncpa [#allocation6 + $0x1], 1 }
 0x2ef   :  { %3998 = vsyncpa [#allocation4], 1 }
 0x2f0   :  { %4000 = vsyncpa [#allocation4 + $0x1], 1 }

</bundles_post_ra>
